<compile_context>
chip_gen: v7x
topology: tpu7x:2x2x1
jax: 0.10.0
libtpu: 0.0.40
codegen_flags: <defaults>
</compile_context>

<pallas_src>
import functools

import jax
import jax.numpy as jnp
from jax import lax
from jax.experimental import pallas as pl
from jax.experimental.pallas import tpu as pltpu


def lstm_classifier_kernel(H, x_ref, len_ref, w_in_ref, w_hh_ref, b_ref,
                           w_fc_ref, b_fc_ref, out_ref):
    TB, E = x_ref.shape                # (T*B, E) bf16, time-major row blocks
    B, SP = len_ref.shape              # SP = padded fused-state width (128)
    T = TB // B
    GP = SP                            # padded gate-group width (128 lanes)

    # ---- hoisted, loop-invariant loads ------------------------------------
    lens = len_ref[...]                # (B, SP) int32, lane-replicated lengths
    x2d = x_ref[...]                   # (T*B, E) bf16
    w_in = w_in_ref[...]               # (E, 4*GP) bf16, gate groups 128-aligned
    w_hh = w_hh_ref[...]               # (SP, 4*GP) bf16, block-diag per direction
    bias = b_ref[...]                  # (1, 4*GP) f32

    # ---- ONE dense input projection for all timesteps, both directions ----
    # per 128-lane gate group: [gate_fwd(H) | gate_bwd(H) | zeros]
    gx = jnp.dot(x2d, w_in, preferred_element_type=jnp.float32) + bias  # (T*B, 4*GP)

    # lane-role masks (hoisted; computed once)
    gate_is_fwd = (lax.broadcasted_iota(jnp.int32, (B, 4 * GP), 1) % GP) < H
    state_is_fwd = lax.broadcasted_iota(jnp.int32, (B, SP), 1) < H

    # ---- fused bidirectional recurrence, fully unrolled (T is static) -----
    # state layout: lanes [0:H]=fwd, [H:2H]=bwd, [2H:SP]=zero padding
    h = jnp.zeros((B, SP), jnp.float32)
    c = jnp.zeros((B, SP), jnp.float32)
    for t in range(T):
        tb = T - 1 - t                                  # backward time index
        gx_t = jnp.where(gate_is_fwd,
                         gx[t * B:(t + 1) * B],
                         gx[tb * B:(tb + 1) * B])        # (B, 4*GP)
        gates = jnp.dot(h.astype(jnp.bfloat16), w_hh,
                        preferred_element_type=jnp.float32) + gx_t
        # each slice is exactly one lane-aligned 128-wide f32 block
        i = jax.nn.sigmoid(gates[:, 0 * GP:1 * GP])
        f = jax.nn.sigmoid(gates[:, 1 * GP:2 * GP])
        g = jnp.tanh(gates[:, 2 * GP:3 * GP])
        o = jax.nn.sigmoid(gates[:, 3 * GP:4 * GP])
        c_new = f * c + i * g
        h_new = o * jnp.tanh(c_new)
        # packed-sequence masking: fwd half updates while t < len, bwd half
        # (consuming x[T-1-t]) only while tb < len.
        eff_t = jnp.where(state_is_fwd, t, tb)
        m = eff_t < lens
        h = jnp.where(m, h_new, h)
        c = jnp.where(m, c_new, c)

    # hidden = cat(h_fwd_final, h_bwd_final) lives in lanes [0:2H]; w_fc rows
    # [2H:SP] are zero so the padding lanes contribute nothing.
    out_ref[...] = (jnp.dot(h.astype(jnp.bfloat16), w_fc_ref[...],
                            preferred_element_type=jnp.float32) + b_fc_ref[...])


def pack_params(params, *, group_pad=128):
    """One-time (eager, outside jit) packing into fused, lane-aligned bf16 mats."""
    E = params["wih_f"].shape[0]
    H = params["whh_f"].shape[0]
    C = params["fc_w"].shape[1]
    GP = group_pad                     # padded gate-group width
    SP = group_pad                     # padded fused-state width

    def gsplit(w):                     # PyTorch gate order [i, f, g, o]
        return [w[:, k * H:(k + 1) * H] for k in range(4)]

    wif, wib = gsplit(params["wih_f"]), gsplit(params["wih_b"])
    whf, whb = gsplit(params["whh_f"]), gsplit(params["whh_b"])
    bf, bb = gsplit(params["b_f"]), gsplit(params["b_b"])

    w_in = jnp.zeros((E, 4 * GP), jnp.float32)
    w_hh = jnp.zeros((SP, 4 * GP), jnp.float32)
    bias = jnp.zeros((1, 4 * GP), jnp.float32)
    for k in range(4):
        w_in = w_in.at[:, k * GP:k * GP + H].set(wif[k])
        w_in = w_in.at[:, k * GP + H:k * GP + 2 * H].set(wib[k])
        w_hh = w_hh.at[:H, k * GP:k * GP + H].set(whf[k])
        w_hh = w_hh.at[H:2 * H, k * GP + H:k * GP + 2 * H].set(whb[k])
        bias = bias.at[:, k * GP:k * GP + H].set(bf[k])
        bias = bias.at[:, k * GP + H:k * GP + 2 * H].set(bb[k])

    w_fc = jnp.zeros((SP, GP), jnp.float32).at[:2 * H, :C].set(params["fc_w"])
    b_fc = jnp.zeros((1, GP), jnp.float32).at[:, :C].set(params["fc_b"])

    return {
        "embedding": params["embedding"].astype(jnp.bfloat16),   # pad row is 0
        "w_in": w_in.astype(jnp.bfloat16),                        # (E, 512)
        "w_hh": w_hh.astype(jnp.bfloat16),                        # (128, 512)
        "bias": bias,                                             # (1, 512) f32
        "w_fc": w_fc.astype(jnp.bfloat16),                        # (128, 128)
        "b_fc": b_fc,                                             # (1, 128) f32
    }


def lstm_classifier_forward(text, text_lengths, packed, *, hidden_dim,
                            num_classes, pad_id):
    B_real, T = text.shape
    emb = packed["embedding"]
    SP = packed["w_hh"].shape[0]                    # padded state width (128)
    GP = packed["b_fc"].shape[1]                    # padded output width (128)
    B = max(8, ((B_real + 7) // 8) * 8)             # sublane-aligned batch pad

    # TODO(synk): embedding lookup (gather) stays in XLA glue; an in-kernel
    # gather via scalar prefetch is not worth it at this size.
    # Flat time-major token ids; pad rows point at pad_id (zero embedding row).
    ids = jnp.full((T, B), pad_id, dtype=jnp.int32).at[:, :B_real].set(
        text.T.astype(jnp.int32))
    x = jnp.take(emb, ids.reshape(-1), axis=0)      # (T*B, E) bf16

    lens = jnp.zeros((B,), jnp.int32).at[:B_real].set(
        text_lengths.astype(jnp.int32))             # pad rows: len=0
    lens_b = jnp.broadcast_to(lens[:, None], (B, SP))   # lane-replicated

    vmem = pl.BlockSpec(memory_space=pltpu.MemorySpace.VMEM)
    out = pl.pallas_call(
        functools.partial(lstm_classifier_kernel, hidden_dim),
        out_shape=jax.ShapeDtypeStruct((B, GP), jnp.float32),
        in_specs=[vmem] * 7,
        out_specs=vmem,
    )(x, lens_b, packed["w_in"], packed["w_hh"], packed["bias"],
      packed["w_fc"], packed["b_fc"])
    return out[:B_real, :num_classes]


def init_params(key, vocab_size, E, H, C, pad_id):
    ks = jax.random.split(key, 11)

    def u(k, shape, scale):
        return jax.random.uniform(k, shape, jnp.float32, -scale, scale)

    s = float(H) ** -0.5
    emb = u(ks[0], (vocab_size, E), 0.1)
    emb = emb.at[pad_id].set(0.0)                   # padding_idx row = 0
    return {
        "embedding": emb,
        # forward direction (weight_ih_l0.T, weight_hh_l0.T, b_ih + b_hh)
        "wih_f": u(ks[1], (E, 4 * H), s),
        "whh_f": u(ks[2], (H, 4 * H), s),
        "b_f": u(ks[3], (1, 4 * H), s) + u(ks[4], (1, 4 * H), s),
        # backward direction (weight_ih_l0_reverse.T, ...)
        "wih_b": u(ks[5], (E, 4 * H), s),
        "whh_b": u(ks[6], (H, 4 * H), s),
        "b_b": u(ks[7], (1, 4 * H), s) + u(ks[8], (1, 4 * H), s),
        # fc: Linear(2H, C) -> stored transposed as (2H, C)
        "fc_w": u(ks[9], (2 * H, C), 0.1),
        "fc_b": u(ks[10], (1, C), 0.1),
    }


def reference_forward(text, text_lengths, params):
    """Pure-JAX f32 reference mirroring the PyTorch forward."""
    emb = params["embedding"][text]
    B, T, _ = emb.shape
    H = params["whh_f"].shape[0]
    lens = text_lengths.astype(jnp.int32)[:, None]

    def run(wih, whh, b, reverse):
        def step(carry, t):
            h, c = carry
            tt = T - 1 - t if reverse else t
            x_t = emb[:, tt, :]
            gates = x_t @ wih + h @ whh + b
            i = jax.nn.sigmoid(gates[:, :H])
            f = jax.nn.sigmoid(gates[:, H:2 * H])
            g = jnp.tanh(gates[:, 2 * H:3 * H])
            o = jax.nn.sigmoid(gates[:, 3 * H:])
            c_new = f * c + i * g
            h_new = o * jnp.tanh(c_new)
            mask = tt < lens
            return (jnp.where(mask, h_new, h), jnp.where(mask, c_new, c)), None

        init = (jnp.zeros((B, H), jnp.float32), jnp.zeros((B, H), jnp.float32))
        (h, _), _ = lax.scan(step, init, jnp.arange(T))
        return h

    h_f = run(params["wih_f"], params["whh_f"], params["b_f"], False)
    h_b = run(params["wih_b"], params["whh_b"], params["b_b"], True)
    hidden = jnp.concatenate([h_f, h_b], axis=-1)
    return hidden @ params["fc_w"] + params["fc_b"]


if __name__ == "__main__":
    vocab_size, E, H, C, pad_id = 50, 16, 32, 4, 0
    B, T = 2, 8

    key = jax.random.PRNGKey(0)
    kp, kt = jax.random.split(key)
    params = init_params(kp, vocab_size, E, H, C, pad_id)
    packed = jax.tree.map(jax.block_until_ready, pack_params(params))  # once, eager

    text = jax.random.randint(kt, (B, T), 1, vocab_size, dtype=jnp.int32)
    text_lengths = jnp.array([8, 5], dtype=jnp.int32)   # descending (enforce_sorted)
    valid = jnp.arange(T)[None, :] < text_lengths[:, None]
    text = jnp.where(valid, text, pad_id)               # pad tail with pad_token_id

    fwd = jax.jit(functools.partial(lstm_classifier_forward,
                                    hidden_dim=H, num_classes=C, pad_id=pad_id))
    logits = jax.block_until_ready(fwd(text, text_lengths, packed))

    ref = reference_forward(text, text_lengths, params)
    assert logits.shape == (B, C)
    # bf16 MXU operands (f32 accumulation) -> compare against f32 reference
    # with a bf16-appropriate tolerance.
    assert jnp.allclose(logits, ref, atol=2e-2, rtol=2e-2), (logits, ref)
    print("KERNEL_OK")
</pallas_src>

<mosaic_0001>
module attributes {stable_mosaic.version = 11 : i64} {
  func.func @lstm_classifier_kernel(%arg0: memref<64x16xbf16, #tpu.memory_space<vmem>>, %arg1: memref<8x128xi32, #tpu.memory_space<vmem>>, %arg2: memref<16x512xbf16, #tpu.memory_space<vmem>>, %arg3: memref<128x512xbf16, #tpu.memory_space<vmem>>, %arg4: memref<1x512xf32, #tpu.memory_space<vmem>>, %arg5: memref<128x128xbf16, #tpu.memory_space<vmem>>, %arg6: memref<1x128xf32, #tpu.memory_space<vmem>>, %arg7: memref<8x128xf32, #tpu.memory_space<vmem>>) attributes {dimension_semantics = [], scalar_prefetch = 0 : i64, scratch_operands = 0 : i64, tpu.core_type = #tpu.core_type<tc>} {
    %c0 = arith.constant 0 : index
    %c0_0 = arith.constant 0 : index
    %0 = vector.load %arg1[%c0, %c0_0] : memref<8x128xi32, #tpu.memory_space<vmem>>, vector<8x128xi32>
    %c0_1 = arith.constant 0 : index
    %c0_2 = arith.constant 0 : index
    %1 = vector.load %arg0[%c0_1, %c0_2] : memref<64x16xbf16, #tpu.memory_space<vmem>>, vector<64x16xbf16>
    %c0_3 = arith.constant 0 : index
    %c0_4 = arith.constant 0 : index
    %2 = vector.load %arg2[%c0_3, %c0_4] : memref<16x512xbf16, #tpu.memory_space<vmem>>, vector<16x512xbf16>
    %c0_5 = arith.constant 0 : index
    %c0_6 = arith.constant 0 : index
    %3 = vector.load %arg3[%c0_5, %c0_6] : memref<128x512xbf16, #tpu.memory_space<vmem>>, vector<128x512xbf16>
    %c0_7 = arith.constant 0 : index
    %c0_8 = arith.constant 0 : index
    %4 = vector.load %arg4[%c0_7, %c0_8] : memref<1x512xf32, #tpu.memory_space<vmem>>, vector<1x512xf32>
    %cst = arith.constant dense<0.000000e+00> : vector<64x512xf32>
    %5 = tpu.matmul %1, %2, %cst {dimension_numbers = #tpu.dot_dimension_numbers<[1], [0], [0], [1], [0, 0, 1, 1], [], []>} : vector<64x16xbf16>, vector<16x512xbf16>, vector<64x512xf32> -> vector<64x512xf32>
    %6 = vector.broadcast %4 : vector<1x512xf32> to vector<64x512xf32>
    %7 = arith.addf %5, %6 : vector<64x512xf32>
    %8 = tpu.iota {dimensions = array<i32: 1>} : vector<8x512xi32>
    %c128_i32 = arith.constant 128 : i32
    %c0_i32 = arith.constant 0 : i32
    %9 = arith.cmpi eq, %c128_i32, %c0_i32 : i32
    %c1_i32 = arith.constant 1 : i32
    %10 = arith.select %9, %c1_i32, %c128_i32 : i32
    %11 = vector.broadcast %10 : i32 to vector<8x512xi32>
    %12 = arith.remsi %8, %11 : vector<8x512xi32>
    %c0_i32_9 = arith.constant 0 : i32
    %13 = vector.broadcast %c0_i32_9 : i32 to vector<8x512xi32>
    %14 = arith.cmpi ne, %12, %13 : vector<8x512xi32>
    %c0_i32_10 = arith.constant 0 : i32
    %15 = vector.broadcast %c0_i32_10 : i32 to vector<8x512xi32>
    %16 = arith.cmpi slt, %12, %15 : vector<8x512xi32>
    %c0_i32_11 = arith.constant 0 : i32
    %17 = arith.cmpi slt, %10, %c0_i32_11 : i32
    %18 = vector.broadcast %17 : i1 to vector<8x512xi1>
    %19 = vector.broadcast %18 : vector<8x512xi1> to vector<8x512xi1>
    %20 = arith.xori %16, %19 : vector<8x512xi1>
    %21 = arith.andi %20, %14 : vector<8x512xi1>
    %22 = vector.broadcast %10 : i32 to vector<8x512xi32>
    %23 = arith.addi %12, %22 : vector<8x512xi32>
    %24 = arith.select %21, %23, %12 : vector<8x512xi1>, vector<8x512xi32>
    %c32_i32 = arith.constant 32 : i32
    %25 = vector.broadcast %c32_i32 : i32 to vector<8x512xi32>
    %26 = arith.cmpi slt, %24, %25 : vector<8x512xi32>
    %27 = tpu.iota {dimensions = array<i32: 1>} : vector<8x128xi32>
    %c32_i32_12 = arith.constant 32 : i32
    %28 = vector.broadcast %c32_i32_12 : i32 to vector<8x128xi32>
    %29 = arith.cmpi slt, %27, %28 : vector<8x128xi32>
    %cst_13 = arith.constant 0.000000e+00 : f32
    %30 = vector.broadcast %cst_13 : f32 to vector<8x128xf32>
    %cst_14 = arith.constant 0.000000e+00 : f32
    %31 = vector.broadcast %cst_14 : f32 to vector<8x128xf32>
    %32 = vector.extract_strided_slice %7 {offsets = [0, 0], sizes = [8, 512], strides = [1, 1]} : vector<64x512xf32> to vector<8x512xf32>
    %33 = vector.extract_strided_slice %7 {offsets = [56, 0], sizes = [8, 512], strides = [1, 1]} : vector<64x512xf32> to vector<8x512xf32>
    %34 = arith.select %26, %32, %33 : vector<8x512xi1>, vector<8x512xf32>
    %35 = arith.truncf %30 : vector<8x128xf32> to vector<8x128xbf16>
    %cst_15 = arith.constant dense<0.000000e+00> : vector<8x512xf32>
    %36 = tpu.matmul %35, %3, %cst_15 {dimension_numbers = #tpu.dot_dimension_numbers<[1], [0], [0], [1], [0, 0, 1, 1], [], []>} : vector<8x128xbf16>, vector<128x512xbf16>, vector<8x512xf32> -> vector<8x512xf32>
    %37 = arith.addf %36, %34 : vector<8x512xf32>
    %38 = vector.extract_strided_slice %37 {offsets = [0, 0], sizes = [8, 128], strides = [1, 1]} : vector<8x512xf32> to vector<8x128xf32>
    %39 = arith.negf %38 : vector<8x128xf32>
    %40 = math.exp %39 : vector<8x128xf32>
    %cst_16 = arith.constant 1.000000e+00 : f32
    %41 = vector.broadcast %cst_16 : f32 to vector<8x128xf32>
    %42 = arith.addf %41, %40 : vector<8x128xf32>
    %43 = arith.divf %41, %42 : vector<8x128xf32>
    %44 = vector.extract_strided_slice %37 {offsets = [0, 128], sizes = [8, 128], strides = [1, 1]} : vector<8x512xf32> to vector<8x128xf32>
    %45 = arith.negf %44 : vector<8x128xf32>
    %46 = math.exp %45 : vector<8x128xf32>
    %cst_17 = arith.constant 1.000000e+00 : f32
    %47 = vector.broadcast %cst_17 : f32 to vector<8x128xf32>
    %48 = arith.addf %47, %46 : vector<8x128xf32>
    %49 = arith.divf %47, %48 : vector<8x128xf32>
    %50 = vector.extract_strided_slice %37 {offsets = [0, 256], sizes = [8, 128], strides = [1, 1]} : vector<8x512xf32> to vector<8x128xf32>
    %51 = math.tanh %50 : vector<8x128xf32>
    %52 = vector.extract_strided_slice %37 {offsets = [0, 384], sizes = [8, 128], strides = [1, 1]} : vector<8x512xf32> to vector<8x128xf32>
    %53 = arith.negf %52 : vector<8x128xf32>
    %54 = math.exp %53 : vector<8x128xf32>
    %cst_18 = arith.constant 1.000000e+00 : f32
    %55 = vector.broadcast %cst_18 : f32 to vector<8x128xf32>
    %56 = arith.addf %55, %54 : vector<8x128xf32>
    %57 = arith.divf %55, %56 : vector<8x128xf32>
    %58 = arith.mulf %49, %31 : vector<8x128xf32>
    %59 = arith.mulf %43, %51 : vector<8x128xf32>
    %60 = arith.addf %58, %59 : vector<8x128xf32>
    %61 = math.tanh %60 : vector<8x128xf32>
    %62 = arith.mulf %57, %61 : vector<8x128xf32>
    %c0_i32_19 = arith.constant 0 : i32
    %c7_i32 = arith.constant 7 : i32
    %63 = vector.broadcast %c0_i32_19 : i32 to vector<8x128xi32>
    %64 = vector.broadcast %c7_i32 : i32 to vector<8x128xi32>
    %65 = arith.select %29, %63, %64 : vector<8x128xi1>, vector<8x128xi32>
    %66 = arith.cmpi slt, %65, %0 : vector<8x128xi32>
    %67 = arith.select %66, %62, %30 : vector<8x128xi1>, vector<8x128xf32>
    %68 = arith.select %66, %60, %31 : vector<8x128xi1>, vector<8x128xf32>
    %69 = vector.extract_strided_slice %7 {offsets = [8, 0], sizes = [8, 512], strides = [1, 1]} : vector<64x512xf32> to vector<8x512xf32>
    %70 = vector.extract_strided_slice %7 {offsets = [48, 0], sizes = [8, 512], strides = [1, 1]} : vector<64x512xf32> to vector<8x512xf32>
    %71 = arith.select %26, %69, %70 : vector<8x512xi1>, vector<8x512xf32>
    %72 = arith.truncf %67 : vector<8x128xf32> to vector<8x128xbf16>
    %cst_20 = arith.constant dense<0.000000e+00> : vector<8x512xf32>
    %73 = tpu.matmul %72, %3, %cst_20 {dimension_numbers = #tpu.dot_dimension_numbers<[1], [0], [0], [1], [0, 0, 1, 1], [], []>} : vector<8x128xbf16>, vector<128x512xbf16>, vector<8x512xf32> -> vector<8x512xf32>
    %74 = arith.addf %73, %71 : vector<8x512xf32>
    %75 = vector.extract_strided_slice %74 {offsets = [0, 0], sizes = [8, 128], strides = [1, 1]} : vector<8x512xf32> to vector<8x128xf32>
    %76 = arith.negf %75 : vector<8x128xf32>
    %77 = math.exp %76 : vector<8x128xf32>
    %cst_21 = arith.constant 1.000000e+00 : f32
    %78 = vector.broadcast %cst_21 : f32 to vector<8x128xf32>
    %79 = arith.addf %78, %77 : vector<8x128xf32>
    %80 = arith.divf %78, %79 : vector<8x128xf32>
    %81 = vector.extract_strided_slice %74 {offsets = [0, 128], sizes = [8, 128], strides = [1, 1]} : vector<8x512xf32> to vector<8x128xf32>
    %82 = arith.negf %81 : vector<8x128xf32>
    %83 = math.exp %82 : vector<8x128xf32>
    %cst_22 = arith.constant 1.000000e+00 : f32
    %84 = vector.broadcast %cst_22 : f32 to vector<8x128xf32>
    %85 = arith.addf %84, %83 : vector<8x128xf32>
    %86 = arith.divf %84, %85 : vector<8x128xf32>
    %87 = vector.extract_strided_slice %74 {offsets = [0, 256], sizes = [8, 128], strides = [1, 1]} : vector<8x512xf32> to vector<8x128xf32>
    %88 = math.tanh %87 : vector<8x128xf32>
    %89 = vector.extract_strided_slice %74 {offsets = [0, 384], sizes = [8, 128], strides = [1, 1]} : vector<8x512xf32> to vector<8x128xf32>
    %90 = arith.negf %89 : vector<8x128xf32>
    %91 = math.exp %90 : vector<8x128xf32>
    %cst_23 = arith.constant 1.000000e+00 : f32
    %92 = vector.broadcast %cst_23 : f32 to vector<8x128xf32>
    %93 = arith.addf %92, %91 : vector<8x128xf32>
    %94 = arith.divf %92, %93 : vector<8x128xf32>
    %95 = arith.mulf %86, %68 : vector<8x128xf32>
    %96 = arith.mulf %80, %88 : vector<8x128xf32>
    %97 = arith.addf %95, %96 : vector<8x128xf32>
    %98 = math.tanh %97 : vector<8x128xf32>
    %99 = arith.mulf %94, %98 : vector<8x128xf32>
    %c1_i32_24 = arith.constant 1 : i32
    %c6_i32 = arith.constant 6 : i32
    %100 = vector.broadcast %c1_i32_24 : i32 to vector<8x128xi32>
    %101 = vector.broadcast %c6_i32 : i32 to vector<8x128xi32>
    %102 = arith.select %29, %100, %101 : vector<8x128xi1>, vector<8x128xi32>
    %103 = arith.cmpi slt, %102, %0 : vector<8x128xi32>
    %104 = arith.select %103, %99, %67 : vector<8x128xi1>, vector<8x128xf32>
    %105 = arith.select %103, %97, %68 : vector<8x128xi1>, vector<8x128xf32>
    %106 = vector.extract_strided_slice %7 {offsets = [16, 0], sizes = [8, 512], strides = [1, 1]} : vector<64x512xf32> to vector<8x512xf32>
    %107 = vector.extract_strided_slice %7 {offsets = [40, 0], sizes = [8, 512], strides = [1, 1]} : vector<64x512xf32> to vector<8x512xf32>
    %108 = arith.select %26, %106, %107 : vector<8x512xi1>, vector<8x512xf32>
    %109 = arith.truncf %104 : vector<8x128xf32> to vector<8x128xbf16>
    %cst_25 = arith.constant dense<0.000000e+00> : vector<8x512xf32>
    %110 = tpu.matmul %109, %3, %cst_25 {dimension_numbers = #tpu.dot_dimension_numbers<[1], [0], [0], [1], [0, 0, 1, 1], [], []>} : vector<8x128xbf16>, vector<128x512xbf16>, vector<8x512xf32> -> vector<8x512xf32>
    %111 = arith.addf %110, %108 : vector<8x512xf32>
    %112 = vector.extract_strided_slice %111 {offsets = [0, 0], sizes = [8, 128], strides = [1, 1]} : vector<8x512xf32> to vector<8x128xf32>
    %113 = arith.negf %112 : vector<8x128xf32>
    %114 = math.exp %113 : vector<8x128xf32>
    %cst_26 = arith.constant 1.000000e+00 : f32
    %115 = vector.broadcast %cst_26 : f32 to vector<8x128xf32>
    %116 = arith.addf %115, %114 : vector<8x128xf32>
    %117 = arith.divf %115, %116 : vector<8x128xf32>
    %118 = vector.extract_strided_slice %111 {offsets = [0, 128], sizes = [8, 128], strides = [1, 1]} : vector<8x512xf32> to vector<8x128xf32>
    %119 = arith.negf %118 : vector<8x128xf32>
    %120 = math.exp %119 : vector<8x128xf32>
    %cst_27 = arith.constant 1.000000e+00 : f32
    %121 = vector.broadcast %cst_27 : f32 to vector<8x128xf32>
    %122 = arith.addf %121, %120 : vector<8x128xf32>
    %123 = arith.divf %121, %122 : vector<8x128xf32>
    %124 = vector.extract_strided_slice %111 {offsets = [0, 256], sizes = [8, 128], strides = [1, 1]} : vector<8x512xf32> to vector<8x128xf32>
    %125 = math.tanh %124 : vector<8x128xf32>
    %126 = vector.extract_strided_slice %111 {offsets = [0, 384], sizes = [8, 128], strides = [1, 1]} : vector<8x512xf32> to vector<8x128xf32>
    %127 = arith.negf %126 : vector<8x128xf32>
    %128 = math.exp %127 : vector<8x128xf32>
    %cst_28 = arith.constant 1.000000e+00 : f32
    %129 = vector.broadcast %cst_28 : f32 to vector<8x128xf32>
    %130 = arith.addf %129, %128 : vector<8x128xf32>
    %131 = arith.divf %129, %130 : vector<8x128xf32>
    %132 = arith.mulf %123, %105 : vector<8x128xf32>
    %133 = arith.mulf %117, %125 : vector<8x128xf32>
    %134 = arith.addf %132, %133 : vector<8x128xf32>
    %135 = math.tanh %134 : vector<8x128xf32>
    %136 = arith.mulf %131, %135 : vector<8x128xf32>
    %c2_i32 = arith.constant 2 : i32
    %c5_i32 = arith.constant 5 : i32
    %137 = vector.broadcast %c2_i32 : i32 to vector<8x128xi32>
    %138 = vector.broadcast %c5_i32 : i32 to vector<8x128xi32>
    %139 = arith.select %29, %137, %138 : vector<8x128xi1>, vector<8x128xi32>
    %140 = arith.cmpi slt, %139, %0 : vector<8x128xi32>
    %141 = arith.select %140, %136, %104 : vector<8x128xi1>, vector<8x128xf32>
    %142 = arith.select %140, %134, %105 : vector<8x128xi1>, vector<8x128xf32>
    %143 = vector.extract_strided_slice %7 {offsets = [24, 0], sizes = [8, 512], strides = [1, 1]} : vector<64x512xf32> to vector<8x512xf32>
    %144 = vector.extract_strided_slice %7 {offsets = [32, 0], sizes = [8, 512], strides = [1, 1]} : vector<64x512xf32> to vector<8x512xf32>
    %145 = arith.select %26, %143, %144 : vector<8x512xi1>, vector<8x512xf32>
    %146 = arith.truncf %141 : vector<8x128xf32> to vector<8x128xbf16>
    %cst_29 = arith.constant dense<0.000000e+00> : vector<8x512xf32>
    %147 = tpu.matmul %146, %3, %cst_29 {dimension_numbers = #tpu.dot_dimension_numbers<[1], [0], [0], [1], [0, 0, 1, 1], [], []>} : vector<8x128xbf16>, vector<128x512xbf16>, vector<8x512xf32> -> vector<8x512xf32>
    %148 = arith.addf %147, %145 : vector<8x512xf32>
    %149 = vector.extract_strided_slice %148 {offsets = [0, 0], sizes = [8, 128], strides = [1, 1]} : vector<8x512xf32> to vector<8x128xf32>
    %150 = arith.negf %149 : vector<8x128xf32>
    %151 = math.exp %150 : vector<8x128xf32>
    %cst_30 = arith.constant 1.000000e+00 : f32
    %152 = vector.broadcast %cst_30 : f32 to vector<8x128xf32>
    %153 = arith.addf %152, %151 : vector<8x128xf32>
    %154 = arith.divf %152, %153 : vector<8x128xf32>
    %155 = vector.extract_strided_slice %148 {offsets = [0, 128], sizes = [8, 128], strides = [1, 1]} : vector<8x512xf32> to vector<8x128xf32>
    %156 = arith.negf %155 : vector<8x128xf32>
    %157 = math.exp %156 : vector<8x128xf32>
    %cst_31 = arith.constant 1.000000e+00 : f32
    %158 = vector.broadcast %cst_31 : f32 to vector<8x128xf32>
    %159 = arith.addf %158, %157 : vector<8x128xf32>
    %160 = arith.divf %158, %159 : vector<8x128xf32>
    %161 = vector.extract_strided_slice %148 {offsets = [0, 256], sizes = [8, 128], strides = [1, 1]} : vector<8x512xf32> to vector<8x128xf32>
    %162 = math.tanh %161 : vector<8x128xf32>
    %163 = vector.extract_strided_slice %148 {offsets = [0, 384], sizes = [8, 128], strides = [1, 1]} : vector<8x512xf32> to vector<8x128xf32>
    %164 = arith.negf %163 : vector<8x128xf32>
    %165 = math.exp %164 : vector<8x128xf32>
    %cst_32 = arith.constant 1.000000e+00 : f32
    %166 = vector.broadcast %cst_32 : f32 to vector<8x128xf32>
    %167 = arith.addf %166, %165 : vector<8x128xf32>
    %168 = arith.divf %166, %167 : vector<8x128xf32>
    %169 = arith.mulf %160, %142 : vector<8x128xf32>
    %170 = arith.mulf %154, %162 : vector<8x128xf32>
    %171 = arith.addf %169, %170 : vector<8x128xf32>
    %172 = math.tanh %171 : vector<8x128xf32>
    %173 = arith.mulf %168, %172 : vector<8x128xf32>
    %c3_i32 = arith.constant 3 : i32
    %c4_i32 = arith.constant 4 : i32
    %174 = vector.broadcast %c3_i32 : i32 to vector<8x128xi32>
    %175 = vector.broadcast %c4_i32 : i32 to vector<8x128xi32>
    %176 = arith.select %29, %174, %175 : vector<8x128xi1>, vector<8x128xi32>
    %177 = arith.cmpi slt, %176, %0 : vector<8x128xi32>
    %178 = arith.select %177, %173, %141 : vector<8x128xi1>, vector<8x128xf32>
    %179 = arith.select %177, %171, %142 : vector<8x128xi1>, vector<8x128xf32>
    %180 = vector.extract_strided_slice %7 {offsets = [32, 0], sizes = [8, 512], strides = [1, 1]} : vector<64x512xf32> to vector<8x512xf32>
    %181 = vector.extract_strided_slice %7 {offsets = [24, 0], sizes = [8, 512], strides = [1, 1]} : vector<64x512xf32> to vector<8x512xf32>
    %182 = arith.select %26, %180, %181 : vector<8x512xi1>, vector<8x512xf32>
    %183 = arith.truncf %178 : vector<8x128xf32> to vector<8x128xbf16>
    %cst_33 = arith.constant dense<0.000000e+00> : vector<8x512xf32>
    %184 = tpu.matmul %183, %3, %cst_33 {dimension_numbers = #tpu.dot_dimension_numbers<[1], [0], [0], [1], [0, 0, 1, 1], [], []>} : vector<8x128xbf16>, vector<128x512xbf16>, vector<8x512xf32> -> vector<8x512xf32>
    %185 = arith.addf %184, %182 : vector<8x512xf32>
    %186 = vector.extract_strided_slice %185 {offsets = [0, 0], sizes = [8, 128], strides = [1, 1]} : vector<8x512xf32> to vector<8x128xf32>
    %187 = arith.negf %186 : vector<8x128xf32>
    %188 = math.exp %187 : vector<8x128xf32>
    %cst_34 = arith.constant 1.000000e+00 : f32
    %189 = vector.broadcast %cst_34 : f32 to vector<8x128xf32>
    %190 = arith.addf %189, %188 : vector<8x128xf32>
    %191 = arith.divf %189, %190 : vector<8x128xf32>
    %192 = vector.extract_strided_slice %185 {offsets = [0, 128], sizes = [8, 128], strides = [1, 1]} : vector<8x512xf32> to vector<8x128xf32>
    %193 = arith.negf %192 : vector<8x128xf32>
    %194 = math.exp %193 : vector<8x128xf32>
    %cst_35 = arith.constant 1.000000e+00 : f32
    %195 = vector.broadcast %cst_35 : f32 to vector<8x128xf32>
    %196 = arith.addf %195, %194 : vector<8x128xf32>
    %197 = arith.divf %195, %196 : vector<8x128xf32>
    %198 = vector.extract_strided_slice %185 {offsets = [0, 256], sizes = [8, 128], strides = [1, 1]} : vector<8x512xf32> to vector<8x128xf32>
    %199 = math.tanh %198 : vector<8x128xf32>
    %200 = vector.extract_strided_slice %185 {offsets = [0, 384], sizes = [8, 128], strides = [1, 1]} : vector<8x512xf32> to vector<8x128xf32>
    %201 = arith.negf %200 : vector<8x128xf32>
    %202 = math.exp %201 : vector<8x128xf32>
    %cst_36 = arith.constant 1.000000e+00 : f32
    %203 = vector.broadcast %cst_36 : f32 to vector<8x128xf32>
    %204 = arith.addf %203, %202 : vector<8x128xf32>
    %205 = arith.divf %203, %204 : vector<8x128xf32>
    %206 = arith.mulf %197, %179 : vector<8x128xf32>
    %207 = arith.mulf %191, %199 : vector<8x128xf32>
    %208 = arith.addf %206, %207 : vector<8x128xf32>
    %209 = math.tanh %208 : vector<8x128xf32>
    %210 = arith.mulf %205, %209 : vector<8x128xf32>
    %c4_i32_37 = arith.constant 4 : i32
    %c3_i32_38 = arith.constant 3 : i32
    %211 = vector.broadcast %c4_i32_37 : i32 to vector<8x128xi32>
    %212 = vector.broadcast %c3_i32_38 : i32 to vector<8x128xi32>
    %213 = arith.select %29, %211, %212 : vector<8x128xi1>, vector<8x128xi32>
    %214 = arith.cmpi slt, %213, %0 : vector<8x128xi32>
    %215 = arith.select %214, %210, %178 : vector<8x128xi1>, vector<8x128xf32>
    %216 = arith.select %214, %208, %179 : vector<8x128xi1>, vector<8x128xf32>
    %217 = vector.extract_strided_slice %7 {offsets = [40, 0], sizes = [8, 512], strides = [1, 1]} : vector<64x512xf32> to vector<8x512xf32>
    %218 = vector.extract_strided_slice %7 {offsets = [16, 0], sizes = [8, 512], strides = [1, 1]} : vector<64x512xf32> to vector<8x512xf32>
    %219 = arith.select %26, %217, %218 : vector<8x512xi1>, vector<8x512xf32>
    %220 = arith.truncf %215 : vector<8x128xf32> to vector<8x128xbf16>
    %cst_39 = arith.constant dense<0.000000e+00> : vector<8x512xf32>
    %221 = tpu.matmul %220, %3, %cst_39 {dimension_numbers = #tpu.dot_dimension_numbers<[1], [0], [0], [1], [0, 0, 1, 1], [], []>} : vector<8x128xbf16>, vector<128x512xbf16>, vector<8x512xf32> -> vector<8x512xf32>
    %222 = arith.addf %221, %219 : vector<8x512xf32>
    %223 = vector.extract_strided_slice %222 {offsets = [0, 0], sizes = [8, 128], strides = [1, 1]} : vector<8x512xf32> to vector<8x128xf32>
    %224 = arith.negf %223 : vector<8x128xf32>
    %225 = math.exp %224 : vector<8x128xf32>
    %cst_40 = arith.constant 1.000000e+00 : f32
    %226 = vector.broadcast %cst_40 : f32 to vector<8x128xf32>
    %227 = arith.addf %226, %225 : vector<8x128xf32>
    %228 = arith.divf %226, %227 : vector<8x128xf32>
    %229 = vector.extract_strided_slice %222 {offsets = [0, 128], sizes = [8, 128], strides = [1, 1]} : vector<8x512xf32> to vector<8x128xf32>
    %230 = arith.negf %229 : vector<8x128xf32>
    %231 = math.exp %230 : vector<8x128xf32>
    %cst_41 = arith.constant 1.000000e+00 : f32
    %232 = vector.broadcast %cst_41 : f32 to vector<8x128xf32>
    %233 = arith.addf %232, %231 : vector<8x128xf32>
    %234 = arith.divf %232, %233 : vector<8x128xf32>
    %235 = vector.extract_strided_slice %222 {offsets = [0, 256], sizes = [8, 128], strides = [1, 1]} : vector<8x512xf32> to vector<8x128xf32>
    %236 = math.tanh %235 : vector<8x128xf32>
    %237 = vector.extract_strided_slice %222 {offsets = [0, 384], sizes = [8, 128], strides = [1, 1]} : vector<8x512xf32> to vector<8x128xf32>
    %238 = arith.negf %237 : vector<8x128xf32>
    %239 = math.exp %238 : vector<8x128xf32>
    %cst_42 = arith.constant 1.000000e+00 : f32
    %240 = vector.broadcast %cst_42 : f32 to vector<8x128xf32>
    %241 = arith.addf %240, %239 : vector<8x128xf32>
    %242 = arith.divf %240, %241 : vector<8x128xf32>
    %243 = arith.mulf %234, %216 : vector<8x128xf32>
    %244 = arith.mulf %228, %236 : vector<8x128xf32>
    %245 = arith.addf %243, %244 : vector<8x128xf32>
    %246 = math.tanh %245 : vector<8x128xf32>
    %247 = arith.mulf %242, %246 : vector<8x128xf32>
    %c5_i32_43 = arith.constant 5 : i32
    %c2_i32_44 = arith.constant 2 : i32
    %248 = vector.broadcast %c5_i32_43 : i32 to vector<8x128xi32>
    %249 = vector.broadcast %c2_i32_44 : i32 to vector<8x128xi32>
    %250 = arith.select %29, %248, %249 : vector<8x128xi1>, vector<8x128xi32>
    %251 = arith.cmpi slt, %250, %0 : vector<8x128xi32>
    %252 = arith.select %251, %247, %215 : vector<8x128xi1>, vector<8x128xf32>
    %253 = arith.select %251, %245, %216 : vector<8x128xi1>, vector<8x128xf32>
    %254 = vector.extract_strided_slice %7 {offsets = [48, 0], sizes = [8, 512], strides = [1, 1]} : vector<64x512xf32> to vector<8x512xf32>
    %255 = vector.extract_strided_slice %7 {offsets = [8, 0], sizes = [8, 512], strides = [1, 1]} : vector<64x512xf32> to vector<8x512xf32>
    %256 = arith.select %26, %254, %255 : vector<8x512xi1>, vector<8x512xf32>
    %257 = arith.truncf %252 : vector<8x128xf32> to vector<8x128xbf16>
    %cst_45 = arith.constant dense<0.000000e+00> : vector<8x512xf32>
    %258 = tpu.matmul %257, %3, %cst_45 {dimension_numbers = #tpu.dot_dimension_numbers<[1], [0], [0], [1], [0, 0, 1, 1], [], []>} : vector<8x128xbf16>, vector<128x512xbf16>, vector<8x512xf32> -> vector<8x512xf32>
    %259 = arith.addf %258, %256 : vector<8x512xf32>
    %260 = vector.extract_strided_slice %259 {offsets = [0, 0], sizes = [8, 128], strides = [1, 1]} : vector<8x512xf32> to vector<8x128xf32>
    %261 = arith.negf %260 : vector<8x128xf32>
    %262 = math.exp %261 : vector<8x128xf32>
    %cst_46 = arith.constant 1.000000e+00 : f32
    %263 = vector.broadcast %cst_46 : f32 to vector<8x128xf32>
    %264 = arith.addf %263, %262 : vector<8x128xf32>
    %265 = arith.divf %263, %264 : vector<8x128xf32>
    %266 = vector.extract_strided_slice %259 {offsets = [0, 128], sizes = [8, 128], strides = [1, 1]} : vector<8x512xf32> to vector<8x128xf32>
    %267 = arith.negf %266 : vector<8x128xf32>
    %268 = math.exp %267 : vector<8x128xf32>
    %cst_47 = arith.constant 1.000000e+00 : f32
    %269 = vector.broadcast %cst_47 : f32 to vector<8x128xf32>
    %270 = arith.addf %269, %268 : vector<8x128xf32>
    %271 = arith.divf %269, %270 : vector<8x128xf32>
    %272 = vector.extract_strided_slice %259 {offsets = [0, 256], sizes = [8, 128], strides = [1, 1]} : vector<8x512xf32> to vector<8x128xf32>
    %273 = math.tanh %272 : vector<8x128xf32>
    %274 = vector.extract_strided_slice %259 {offsets = [0, 384], sizes = [8, 128], strides = [1, 1]} : vector<8x512xf32> to vector<8x128xf32>
    %275 = arith.negf %274 : vector<8x128xf32>
    %276 = math.exp %275 : vector<8x128xf32>
    %cst_48 = arith.constant 1.000000e+00 : f32
    %277 = vector.broadcast %cst_48 : f32 to vector<8x128xf32>
    %278 = arith.addf %277, %276 : vector<8x128xf32>
    %279 = arith.divf %277, %278 : vector<8x128xf32>
    %280 = arith.mulf %271, %253 : vector<8x128xf32>
    %281 = arith.mulf %265, %273 : vector<8x128xf32>
    %282 = arith.addf %280, %281 : vector<8x128xf32>
    %283 = math.tanh %282 : vector<8x128xf32>
    %284 = arith.mulf %279, %283 : vector<8x128xf32>
    %c6_i32_49 = arith.constant 6 : i32
    %c1_i32_50 = arith.constant 1 : i32
    %285 = vector.broadcast %c6_i32_49 : i32 to vector<8x128xi32>
    %286 = vector.broadcast %c1_i32_50 : i32 to vector<8x128xi32>
    %287 = arith.select %29, %285, %286 : vector<8x128xi1>, vector<8x128xi32>
    %288 = arith.cmpi slt, %287, %0 : vector<8x128xi32>
    %289 = arith.select %288, %284, %252 : vector<8x128xi1>, vector<8x128xf32>
    %290 = arith.select %288, %282, %253 : vector<8x128xi1>, vector<8x128xf32>
    %291 = vector.extract_strided_slice %7 {offsets = [56, 0], sizes = [8, 512], strides = [1, 1]} : vector<64x512xf32> to vector<8x512xf32>
    %292 = vector.extract_strided_slice %7 {offsets = [0, 0], sizes = [8, 512], strides = [1, 1]} : vector<64x512xf32> to vector<8x512xf32>
    %293 = arith.select %26, %291, %292 : vector<8x512xi1>, vector<8x512xf32>
    %294 = arith.truncf %289 : vector<8x128xf32> to vector<8x128xbf16>
    %cst_51 = arith.constant dense<0.000000e+00> : vector<8x512xf32>
    %295 = tpu.matmul %294, %3, %cst_51 {dimension_numbers = #tpu.dot_dimension_numbers<[1], [0], [0], [1], [0, 0, 1, 1], [], []>} : vector<8x128xbf16>, vector<128x512xbf16>, vector<8x512xf32> -> vector<8x512xf32>
    %296 = arith.addf %295, %293 : vector<8x512xf32>
    %297 = vector.extract_strided_slice %296 {offsets = [0, 0], sizes = [8, 128], strides = [1, 1]} : vector<8x512xf32> to vector<8x128xf32>
    %298 = arith.negf %297 : vector<8x128xf32>
    %299 = math.exp %298 : vector<8x128xf32>
    %cst_52 = arith.constant 1.000000e+00 : f32
    %300 = vector.broadcast %cst_52 : f32 to vector<8x128xf32>
    %301 = arith.addf %300, %299 : vector<8x128xf32>
    %302 = arith.divf %300, %301 : vector<8x128xf32>
    %303 = vector.extract_strided_slice %296 {offsets = [0, 128], sizes = [8, 128], strides = [1, 1]} : vector<8x512xf32> to vector<8x128xf32>
    %304 = arith.negf %303 : vector<8x128xf32>
    %305 = math.exp %304 : vector<8x128xf32>
    %cst_53 = arith.constant 1.000000e+00 : f32
    %306 = vector.broadcast %cst_53 : f32 to vector<8x128xf32>
    %307 = arith.addf %306, %305 : vector<8x128xf32>
    %308 = arith.divf %306, %307 : vector<8x128xf32>
    %309 = vector.extract_strided_slice %296 {offsets = [0, 256], sizes = [8, 128], strides = [1, 1]} : vector<8x512xf32> to vector<8x128xf32>
    %310 = math.tanh %309 : vector<8x128xf32>
    %311 = vector.extract_strided_slice %296 {offsets = [0, 384], sizes = [8, 128], strides = [1, 1]} : vector<8x512xf32> to vector<8x128xf32>
    %312 = arith.negf %311 : vector<8x128xf32>
    %313 = math.exp %312 : vector<8x128xf32>
    %cst_54 = arith.constant 1.000000e+00 : f32
    %314 = vector.broadcast %cst_54 : f32 to vector<8x128xf32>
    %315 = arith.addf %314, %313 : vector<8x128xf32>
    %316 = arith.divf %314, %315 : vector<8x128xf32>
    %317 = arith.mulf %308, %290 : vector<8x128xf32>
    %318 = arith.mulf %302, %310 : vector<8x128xf32>
    %319 = arith.addf %317, %318 : vector<8x128xf32>
    %320 = math.tanh %319 : vector<8x128xf32>
    %321 = arith.mulf %316, %320 : vector<8x128xf32>
    %c7_i32_55 = arith.constant 7 : i32
    %c0_i32_56 = arith.constant 0 : i32
    %322 = vector.broadcast %c7_i32_55 : i32 to vector<8x128xi32>
    %323 = vector.broadcast %c0_i32_56 : i32 to vector<8x128xi32>
    %324 = arith.select %29, %322, %323 : vector<8x128xi1>, vector<8x128xi32>
    %325 = arith.cmpi slt, %324, %0 : vector<8x128xi32>
    %326 = arith.select %325, %321, %289 : vector<8x128xi1>, vector<8x128xf32>
    %327 = arith.truncf %326 : vector<8x128xf32> to vector<8x128xbf16>
    %c0_57 = arith.constant 0 : index
    %c0_58 = arith.constant 0 : index
    %328 = vector.load %arg5[%c0_57, %c0_58] : memref<128x128xbf16, #tpu.memory_space<vmem>>, vector<128x128xbf16>
    %cst_59 = arith.constant dense<0.000000e+00> : vector<8x128xf32>
    %329 = tpu.matmul %327, %328, %cst_59 {dimension_numbers = #tpu.dot_dimension_numbers<[1], [0], [0], [1], [0, 0, 1, 1], [], []>} : vector<8x128xbf16>, vector<128x128xbf16>, vector<8x128xf32> -> vector<8x128xf32>
    %c0_60 = arith.constant 0 : index
    %c0_61 = arith.constant 0 : index
    %330 = vector.load %arg6[%c0_60, %c0_61] : memref<1x128xf32, #tpu.memory_space<vmem>>, vector<1x128xf32>
    %331 = vector.broadcast %330 : vector<1x128xf32> to vector<8x128xf32>
    %332 = arith.addf %329, %331 : vector<8x128xf32>
    %c0_62 = arith.constant 0 : index
    %c0_63 = arith.constant 0 : index
    %333 = vector.load %arg7[%c0_62, %c0_63] : memref<8x128xf32, #tpu.memory_space<vmem>>, vector<8x128xf32>
    tpu.vector_store %arg7[%c0_62, %c0_63], %332 {strides = array<i32>} : memref<8x128xf32, #tpu.memory_space<vmem>>, vector<8x128xf32>,
    return
  }
}

</mosaic_0001>

<bundles_post_ra>
// kernel: lstm_classifier_forward.1
= control target key start
LH: loop header
LB: loop body
LE: loop exit
PB: predicated region body
PF: predicated region fallthrough
CT: control target
= control target key end

     0   :  { %v3091_v1 = vmov 0   ;;  %vm134_vm0 = vcmask 130048   ;;  %v74_v41 = vlaneseq  ;;  %vm1908_vm13 = vmmov 0   ;;  %s3083_s2 = inlined_call_operand.vmem [shape: bf16[16,512], index: 2, kind: input, shape index: {}]   ;;  %s3084_s0 = inlined_call_operand.vmem [shape: bf16[64,16], index: 0, kind: input, shape index: {}]   ;;  %s3085_s3 = inlined_call_operand.vmem [shape: bf16[128,512], index: 3, kind: input, shape index: {}]   ;;  %s3086_s4 = inlined_call_operand.vmem [shape: f32[1,512], index: 4, kind: input, shape index: {}]   ;;  %s3087_s1 = inlined_call_operand.vmem [shape: s32[8,128], index: 1, kind: input, shape index: {}]   ;;  %s3088_s5 = inlined_call_operand.vmem [shape: bf16[128,128], index: 5, kind: input, shape index: {}]   ;;  %s3089_s6 = inlined_call_operand.vmem [shape: f32[1,128], index: 6, kind: input, shape index: {}]   ;;  %s3090_s7 = inlined_call_operand.vmem [shape: f32[8,128], index: 7, kind: output, shape index: {}]  }
   0x1   :  { %v1672_v0 = vld [vmem:[%s3083_s2 + $0x4] ss:$16 sps:$4 sm:$0xff]   ;;  %179 = vmatprep.mubr.bf16.mxu0 %v3091_v1  ;;  %252 = vmatprep.mubr.bf16.mxu1 %v3091_v1  ;;  %v1674_v2 = vld [vmem:[%s3083_s2 + $0xc] ss:$16 sps:$4 sm:$0xff]   ;;  %v1676_v3 = vld [vmem:[%s3083_s2] ss:$16 sps:$4 sm:$0xff]  }
   0x2   :  { %147 = vmatprep.subr.bf16.mxu0 %v1672_v0  ;;  %v1677_v4 = vld [vmem:[%s3083_s2 + $0x8] ss:$16 sps:$4 sm:$0xff]   ;;  %220 = vmatprep.subr.bf16.mxu1 %v1674_v2  ;;  %v1678_v5 = vld [vmem:[%s3084_s0] sm:$0xff]   ;;  %v1974_v7 = vld [vmem:[%s3085_s3 + $0xc] ss:$16 sps:$4 sm:$0xff]   ;;  %v75_v42 = vshrl.u32 %v74_v41, 7 }
   0x3   :  { %148 = vmatpush1.bf16.msra.mxu0 %v1676_v3  ;;  %221 = vmatpush1.bf16.msra.mxu1 %v1677_v4  ;;  %v1969_v6 = vld [vmem:[%s3085_s3 + $0x4] ss:$16 sps:$4 sm:$0xff]   ;;  %3141 = vst [vmem:[#allocation3_spill] sm:$0xff] %v1974_v7  ;;  %v1979_v8 = vld [vmem:[%s3085_s3] ss:$16 sps:$4 sm:$0xff]   ;;  %v1691_v14 = vld [vmem:[%s3084_s0 + $0x8] sm:$0xff]  }
   0x4   :  { %3140 = vst [vmem:[#allocation2_spill] sm:$0xff] %v1969_v6  ;;  %515 = vmatprep.subr.bf16.mxu0 %v1969_v6  ;;  %v1985_v9 = vld [vmem:[%s3085_s3 + $0x8] ss:$16 sps:$4 sm:$0xff]   ;;  %v1992_v10 = vld [vmem:[%s3085_s3 + $0x24] ss:$16 sps:$4 sm:$0xff]   ;;  %556 = vmatprep.subr.bf16.mxu1 %v1974_v7  ;;  %v84_v43 = vsub.s32 2, %v75_v42 }
   0x5   :  { %v1999_v11 = vld [vmem:[%s3085_s3 + $0x2c] ss:$16 sps:$4 sm:$0xff]   ;;  %v2004_v12 = vld [vmem:[%s3085_s3 + $0x20] ss:$16 sps:$4 sm:$0xff]   ;;  %v2009_v13 = vld [vmem:[%s3085_s3 + $0x28] ss:$16 sps:$4 sm:$0xff]  }
   0x6   :  { %1554 = vmatmul.mubr.msk.bf16.vlgmr.msra.gmra.mrb[0].mxu0 %vm134_vm0, %v1678_v5  ;;  %1558 = vmatmul.mubr.msk.bf16.vlgmr.msra.gmra.mrb[0].mxu1 %vm134_vm0, %v1678_v5  ;;  %v2021_v15 = vld [vmem:[%s3085_s3 + $0x44] ss:$16 sps:$4 sm:$0xff]   ;;  %v2027_v16 = vld [vmem:[%s3085_s3 + $0x4c] ss:$16 sps:$4 sm:$0xff]   ;;  %v2033_v17 = vld [vmem:[%s3085_s3 + $0x40] ss:$16 sps:$4 sm:$0xff]  }
   0x7   :  { %516 = vmatpush1.bf16.msra.mxu0 %v1979_v8  ;;  %557 = vmatpush1.bf16.msra.mxu1 %v1985_v9  ;;  %v2038_v18 = vld [vmem:[%s3085_s3 + $0x48] ss:$16 sps:$4 sm:$0xff]   ;;  %v2045_v19 = vld [vmem:[%s3085_s3 + $0x64] ss:$16 sps:$4 sm:$0xff]   ;;  %v2051_v20 = vld [vmem:[%s3085_s3 + $0x6c] ss:$16 sps:$4 sm:$0xff]  }
   0x8   :  { %517 = vmatprep.subr.bf16.mxu0 %v1992_v10  ;;  %558 = vmatprep.subr.bf16.mxu1 %v1999_v11  ;;  %v2058_v21 = vld [vmem:[%s3085_s3 + $0x60] ss:$16 sps:$4 sm:$0xff]   ;;  %v2064_v22 = vld [vmem:[%s3085_s3 + $0x68] ss:$16 sps:$4 sm:$0xff]   ;;  %v2072_v23 = vld [vmem:[%s3085_s3 + $0x84] ss:$16 sps:$4 sm:$0xff]  }
   0x9   :  { %189 = vmatprep.mubr.bf16.mxu0 %v3091_v1  ;;  %262 = vmatprep.mubr.bf16.mxu1 %v3091_v1  ;;  %v2079_v24 = vld [vmem:[%s3085_s3 + $0x8c] ss:$16 sps:$4 sm:$0xff]   ;;  %v1704_v25 = vld [vmem:[%s3084_s0 + $0x10] sm:$0xff]   ;;  %v2095_v27 = vld [vmem:[%s3085_s3 + $0x88] ss:$16 sps:$4 sm:$0xff]   ;;  %v88_v44 = vsub.s32 3, %v75_v42 }
   0xa   :  { %v2088_v26 = vld [vmem:[%s3085_s3 + $0x80] ss:$16 sps:$4 sm:$0xff]   ;;  %v2100_v28 = vld [vmem:[%s3085_s3 + $0xa4] ss:$16 sps:$4 sm:$0xff]   ;;  %v2106_v29 = vld [vmem:[%s3085_s3 + $0xac] ss:$16 sps:$4 sm:$0xff]  }
   0xb   :  { %518 = vmatpush1.bf16.msra.mxu0 %v2004_v12  ;;  %559 = vmatpush1.bf16.msra.mxu1 %v2009_v13  ;;  %v2114_v30 = vld [vmem:[%s3085_s3 + $0xa0] ss:$16 sps:$4 sm:$0xff]   ;;  %v2119_v31 = vld [vmem:[%s3085_s3 + $0xa8] ss:$16 sps:$4 sm:$0xff]   ;;  %v2127_v32 = vld [vmem:[%s3085_s3 + $0xc4] ss:$16 sps:$4 sm:$0xff]  }
   0xc   :  { %519 = vmatprep.subr.bf16.mxu0 %v2021_v15  ;;  %560 = vmatprep.subr.bf16.mxu1 %v2027_v16  ;;  %v2134_v33 = vld [vmem:[%s3085_s3 + $0xcc] ss:$16 sps:$4 sm:$0xff]   ;;  %v2143_v35 = vld [vmem:[%s3085_s3 + $0xc0] ss:$16 sps:$4 sm:$0xff]   ;;  %v2150_v36 = vld [vmem:[%s3085_s3 + $0xc8] ss:$16 sps:$4 sm:$0xff]  }
   0xd   :  { %v1717_v34 = vld [vmem:[%s3084_s0 + $0x18] sm:$0xff]   ;;  %v2155_v37 = vld [vmem:[%s3085_s3 + $0xe4] ss:$16 sps:$4 sm:$0xff]   ;;  %v2169_v39 = vld [vmem:[%s3085_s3 + $0xe0] ss:$16 sps:$4 sm:$0xff]   ;;  %v76_v45 = vsub.s32 0, %v75_v42 }
   0xe   :  { %1555 = vmatmul.mubr.msk.bf16.gmra.mrb[4].mxu0 %vm134_vm0, %v1691_v14  ;;  %1559 = vmatmul.mubr.msk.bf16.gmra.mrb[4].mxu1 %vm134_vm0, %v1691_v14  ;;  %3142 = vst [vmem:[#allocation4_spill] sm:$0xff] %v2155_v37  ;;  %v2161_v38 = vld [vmem:[%s3085_s3 + $0xec] ss:$16 sps:$4 sm:$0xff]   ;;  %3144 = vst [vmem:[#allocation6_spill] sm:$0xff] %v2169_v39  ;;  %v2177_v40 = vld [vmem:[%s3085_s3 + $0xe8] ss:$16 sps:$4 sm:$0xff]  }
   0xf   :  { %520 = vmatpush1.bf16.msra.mxu0 %v2033_v17  ;;  %199 = vmatprep.mubr.bf16.mxu0 %v3091_v1  ;;  %3143 = vst [vmem:[#allocation5_spill] sm:$0xff] %v2161_v38  ;;  %3145 = vst [vmem:[#allocation7_spill] sm:$0xff] %v2177_v40  ;;  %v72_v46 = vld [vmem:[%s3086_s4] sm:$0xf]  ;;  %v80_v47 = vsub.s32 1, %v75_v42  ;;  %v2252_v0 = vand.u32 127, %v74_v41 }
  0x10   :  { %561 = vmatpush1.bf16.msra.mxu1 %v2038_v18  ;;  %521 = vmatprep.subr.bf16.mxu0 %v2045_v19  ;;  %v2224_v48 = vrot.slane %v72_v46, %v84_v43  ;;  %v2230_v51 = vrot.slane %v72_v46, %v88_v44  ;;  %v2232_v52 = vrot.slane %v72_v46, %v76_v45 }
  0x11   :  { %562 = vmatprep.subr.bf16.mxu1 %v2051_v20  ;;  %272 = vmatprep.mubr.bf16.mxu1 %v3091_v1  ;;  %v2238_v55 = vrot.slane %v72_v46, %v80_v47  ;;  %v296_v4 = vadd.s32 256, %v2252_v0  ;;  %v295_v42 = vadd.s32 128, %v2252_v0  ;;  %v297_v43 = vadd.s32 384, %v2252_v0 }
  0x12   :  { %vm346_vm1 = vcmp.lt.s32.totalorder %v2252_v0, 32 }
  0x13   :  { %522 = vmatpush1.bf16.msra.mxu0 %v2058_v21 }
  0x14   :  { %563 = vmatpush1.bf16.msra.mxu1 %v2064_v22  ;;  %523 = vmatprep.subr.bf16.mxu0 %v2072_v23 }
  0x15   :  { %564 = vmatprep.subr.bf16.mxu1 %v2079_v24 }
  0x16   :  { %1556 = vmatmul.mubr.msk.bf16.gmra.mrb[8].mxu0 %vm134_vm0, %v1704_v25  ;;  %1560 = vmatmul.mubr.msk.bf16.gmra.mrb[8].mxu1 %vm134_vm0, %v1704_v25 }
  0x17   :  { %524 = vmatpush1.bf16.msra.mxu0 %v2088_v26  ;;  %209 = vmatprep.mubr.bf16.mxu0 %v3091_v1 }
  0x18   :  { %565 = vmatpush1.bf16.msra.mxu1 %v2095_v27  ;;  %525 = vmatprep.subr.bf16.mxu0 %v2100_v28 }
  0x19   :  { %566 = vmatprep.subr.bf16.mxu1 %v2106_v29  ;;  %282 = vmatprep.mubr.bf16.mxu1 %v3091_v1 }
  0x1b   :  { %526 = vmatpush1.bf16.msra.mxu0 %v2114_v30 }
  0x1c   :  { %567 = vmatpush1.bf16.msra.mxu1 %v2119_v31  ;;  %527 = vmatprep.subr.bf16.mxu0 %v2127_v32 }
  0x1d   :  { %568 = vmatprep.subr.bf16.mxu1 %v2134_v33 }
  0x1e   :  { %1557 = vmatmul.mubr.msk.bf16.gmra.mrb[12].mxu0 %vm134_vm0, %v1717_v34  ;;  %1561 = vmatmul.mubr.msk.bf16.gmra.mrb[12].mxu1 %vm134_vm0, %v1717_v34 }
  0x1f   :  { %528 = vmatpush1.bf16.msra.mxu0 %v2143_v35  ;;  %547 = vmatprep.mubr.bf16.mxu0 %v3091_v1 }
  0x20   :  { %569 = vmatpush1.bf16.msra.mxu1 %v2150_v36  ;;  %529 = vmatprep.subr.bf16.mxu0 %v2155_v37 }
  0x21   :  { %570 = vmatprep.subr.bf16.mxu1 %v2161_v38  ;;  %588 = vmatprep.mubr.bf16.mxu1 %v3091_v1 }
  0x23   :  { %530 = vmatpush1.bf16.msra.mxu0 %v2169_v39 }
  0x24   :  { %571 = vmatpush1.bf16.msra.mxu1 %v2177_v40  ;;  %630 = vmatprep.subr.bf16.mxu0 %v1969_v6 }
  0x25   :  { %671 = vmatprep.subr.bf16.mxu1 %v1974_v7 }
  0x26   :  { %548 = vmatmul.mubr.bf16.vlgmr.msra.gmra.mrb[16].mxu0 %v3091_v1 }
  0x27   :  { %589 = vmatmul.mubr.bf16.vlgmr.msra.gmra.mrb[16].mxu1 %v3091_v1  ;;  %631 = vmatpush1.bf16.msra.mxu0 %v1979_v8 }
  0x28   :  { %672 = vmatpush1.bf16.msra.mxu1 %v1985_v9  ;;  %632 = vmatprep.subr.bf16.mxu0 %v1992_v10 }
  0x29   :  { %673 = vmatprep.subr.bf16.mxu1 %v1999_v11  ;;  %662 = vmatprep.mubr.bf16.mxu0 %v3091_v1 }
  0x2a   :  { %703 = vmatprep.mubr.bf16.mxu1 %v3091_v1  ;;  %v323_v1 = vand.u32 127, %v297_v43 }
  0x2b   :  { %633 = vmatpush1.bf16.msra.mxu0 %v2004_v12 }
  0x2c   :  { %674 = vmatpush1.bf16.msra.mxu1 %v2009_v13  ;;  %634 = vmatprep.subr.bf16.mxu0 %v2021_v15  ;;  %vm2290_vm4 = vcmp.lt.s32.totalorder %v323_v1, 32 }
  0x2d   :  { %675 = vmatprep.subr.bf16.mxu1 %v2027_v16 }
  0x2f   :  { %635 = vmatpush1.bf16.msra.mxu0 %v2033_v17 }
  0x30   :  { %676 = vmatpush1.bf16.msra.mxu1 %v2038_v18  ;;  %636 = vmatprep.subr.bf16.mxu0 %v2045_v19 }
  0x31   :  { %677 = vmatprep.subr.bf16.mxu1 %v2051_v20 }
  0x33   :  { %637 = vmatpush1.bf16.msra.mxu0 %v2058_v21 }
  0x34   :  { %678 = vmatpush1.bf16.msra.mxu1 %v2064_v22  ;;  %638 = vmatprep.subr.bf16.mxu0 %v2072_v23 }
  0x35   :  { %679 = vmatprep.subr.bf16.mxu1 %v2079_v24 }
  0x37   :  { %639 = vmatpush1.bf16.msra.mxu0 %v2088_v26 }
  0x38   :  { %680 = vmatpush1.bf16.msra.mxu1 %v2095_v27  ;;  %640 = vmatprep.subr.bf16.mxu0 %v2100_v28 }
  0x39   :  { %681 = vmatprep.subr.bf16.mxu1 %v2106_v29 }
  0x3b   :  { %641 = vmatpush1.bf16.msra.mxu0 %v2114_v30 }
  0x3c   :  { %682 = vmatpush1.bf16.msra.mxu1 %v2119_v31  ;;  %642 = vmatprep.subr.bf16.mxu0 %v2127_v32 }
  0x3d   :  { %683 = vmatprep.subr.bf16.mxu1 %v2134_v33 }
  0x3f   :  { %643 = vmatpush1.bf16.msra.mxu0 %v2143_v35 }
  0x40   :  { %684 = vmatpush1.bf16.msra.mxu1 %v2150_v36  ;;  %644 = vmatprep.subr.bf16.mxu0 %v2155_v37 }
  0x41   :  { %685 = vmatprep.subr.bf16.mxu1 %v2161_v38 }
  0x43   :  { %645 = vmatpush1.bf16.msra.mxu0 %v2169_v39 }
  0x44   :  { %686 = vmatpush1.bf16.msra.mxu1 %v2177_v40  ;;  %745 = vmatprep.subr.bf16.mxu0 %v1969_v6 }
  0x45   :  { %786 = vmatprep.subr.bf16.mxu1 %v1974_v7 }
  0xd9   :  { %v2226_v49 = vpop.f32.mrb[0].mxu0  ;;  %v2228_v50 = vpop.f32.mrb[0].mxu1 }
  0xda   :  { %v2234_v53 = vpop.f32.mrb[1].mxu0  ;;  %v2236_v54 = vpop.f32.mrb[1].mxu1 }
  0xdb   :  { %v185_v56 = vpop.f32.mrb[2].mxu0  ;;  %v258_v57 = vpop.f32.mrb[2].mxu1 }
  0xdc   :  { %v2241_v58 = vadd.f32 %v185_v56, %v2232_v52  ;;  %v187_v59 = vpop.f32.mrb[3].mxu0  ;;  %v2244_v60 = vadd.f32 %v258_v57, %v2224_v48  ;;  %v260_v61 = vpop.f32.mrb[3].mxu1 }
  0xdd   :  { %v2247_v62 = vadd.f32 %v187_v59, %v2238_v55  ;;  %v2250_v63 = vadd.f32 %v260_v61, %v2230_v51 }
  0xde   :  { %3146 = vst [vmem:[#allocation8_spill] sm:$0xff] %v2244_v60 }
  0xdf   :  { %3147 = vst [vmem:[#allocation9_spill] sm:$0xff] %v2247_v62  ;;  %3148 = vst [vmem:[#allocation10_spill] sm:$0xff] %v2250_v63 }
  0xe1   :  { %v191_v2 = vpop.f32.mrb[4].mxu0  ;;  %v264_v3 = vpop.f32.mrb[4].mxu1 }
  0xe2   :  { %v192_v5 = vadd.f32 %v191_v2, %v2232_v52  ;;  %v193_v14 = vpop.f32.mrb[5].mxu0  ;;  %v2257_v25 = vadd.f32 %v264_v3, %v2224_v48  ;;  %v266_v34 = vpop.f32.mrb[5].mxu1  ;;  %v316_v3 = vand.u32 127, %v296_v4 }
  0xe3   :  { %v2262_v44 = vadd.f32 %v193_v14, %v2238_v55  ;;  %v195_v41 = vpop.f32.mrb[6].mxu0  ;;  %v2265_v45 = vadd.f32 %v266_v34, %v2230_v51  ;;  %v268_v46 = vpop.f32.mrb[6].mxu1  ;;  %v309_v14 = vand.u32 127, %v295_v42 }
  0xe4   :  { %v196_v47 = vadd.f32 %v195_v41, %v2232_v52  ;;  %v197_v56 = vpop.f32.mrb[7].mxu0  ;;  %v2269_v57 = vadd.f32 %v268_v46, %v2224_v48  ;;  %v270_v59 = vpop.f32.mrb[7].mxu1  ;;  %vm2278_vm2 = vcmp.lt.s32.totalorder %v316_v3, 32 }
  0xe5   :  { %3149 = vst [vmem:[#allocation11_spill] sm:$0xff] %v2262_v44  ;;  %3150 = vst [vmem:[#allocation12_spill] sm:$0xff] %v2265_v45  ;;  %v2272_v61 = vadd.f32 %v197_v56, %v2238_v55  ;;  %v2275_v2 = vadd.f32 %v270_v59, %v2230_v51  ;;  %vm2286_vm3 = vcmp.lt.s32.totalorder %v309_v14, 32  ;;  %v3157_v59 = vmov 0 }
  0xe6   :  { %3151 = vst [vmem:[#allocation13_spill] sm:$0xff] %v2269_v57  ;;  %v3158_v59 = vsel %vm2286_vm3, 4294967295, %v3157_v59 }
  0xe7   :  { %3152 = vst [vmem:[#allocation14_spill] sm:$0xff] %v2272_v61  ;;  %3153 = vst [vmem:[#allocation15_spill] sm:$0xff] %v2275_v2 }
  0xe8   :  { %3159 = vst [vmem:[#allocation17_spill] sm:$0xff] %v3158_v59 }
  0xe9   :  { %v201_v7 = vpop.f32.mrb[8].mxu0  ;;  %v274_v34 = vpop.f32.mrb[8].mxu1 }
  0xea   :  { %v202_v46 = vadd.f32 %v201_v7, %v2232_v52  ;;  %v203_v6 = vpop.f32.mrb[9].mxu0  ;;  %v2284_v56 = vadd.f32 %v274_v34, %v2224_v48  ;;  %v276_v40 = vpop.f32.mrb[9].mxu1 }
  0xeb   :  { %v2295_v42 = vadd.f32 %v203_v6, %v2238_v55  ;;  %v205_v43 = vpop.f32.mrb[10].mxu0  ;;  %v2298_v3 = vadd.f32 %v276_v40, %v2230_v51  ;;  %v278_v7 = vpop.f32.mrb[10].mxu1 }
  0xec   :  { %3156 = vst [vmem:[#allocation16_spill] sm:$0xff] %v2284_v56  ;;  %v206_v34 = vadd.f32 %v205_v43, %v2232_v52  ;;  %v207_v39 = vpop.f32.mrb[11].mxu0  ;;  %v2302_v14 = vadd.f32 %v278_v7, %v2224_v48  ;;  %v280_v38 = vpop.f32.mrb[11].mxu1  ;;  %v2306_v1 = vsel %vm346_vm1, %v196_v47, %v202_v46 }
  0xed   :  { %3162 = vst [vmem:[#allocation18_spill] sm:$0xff] %v2295_v42  ;;  %3163 = vst [vmem:[#allocation19_spill] sm:$0xff] %v2298_v3  ;;  %v2313_v40 = vadd.f32 %v207_v39, %v2238_v55  ;;  %v2316_v37 = vadd.f32 %v280_v38, %v2230_v51  ;;  %v2336_v39 = vsel %vm346_vm1, %v202_v46, %v196_v47 }
  0xee   :  { %3164 = vst [vmem:[#allocation20_spill] sm:$0xff] %v2302_v14  ;;  %3165 = vst [vmem:[#allocation21_spill] sm:$0xff] %v2306_v1  ;;  %v2328_v1 = vsel %vm346_vm1, %v192_v5, %v206_v34  ;;  %v2360_v43 = vsel %vm346_vm1, %v206_v34, %v192_v5  ;;  %v182_v5 = vadd.f32 %v2226_v49, %v2232_v52 }
  0xef   :  { %3166 = vst [vmem:[#allocation22_spill] sm:$0xff] %v2313_v40  ;;  %3167 = vst [vmem:[#allocation23_spill] sm:$0xff] %v2316_v37  ;;  %v2378_v34 = vadd.f32 %v2228_v50, %v2224_v48  ;;  %v2386_v3 = vadd.f32 %v2234_v53, %v2238_v55  ;;  %v2390_v47 = vadd.f32 %v2236_v54, %v2230_v51 }
  0xf0   :  { %3168 = vst [vmem:[#allocation24_spill] sm:$0xff] %v2336_v39  ;;  %3169 = vst [vmem:[#allocation25_spill] sm:$0xff] %v2360_v43 }
  0xf1   :  { %v211_v46 = vpop.f32.mrb[12].mxu0  ;;  %v284_v38 = vpop.f32.mrb[12].mxu1  ;;  %3170 = vst [vmem:[#allocation26_spill] sm:$0xff] %v2378_v34  ;;  %3172 = vst [vmem:[#allocation28_spill] sm:$0xff] %v2386_v3 }
  0xf2   :  { %v212_v7 = vadd.f32 %v211_v46, %v2232_v52  ;;  %v2382_v43 = vadd.f32 %v284_v38, %v2224_v48  ;;  %v213_v6 = vpop.f32.mrb[13].mxu0  ;;  %v286_v39 = vpop.f32.mrb[13].mxu1  ;;  %3173 = vst [vmem:[#allocation29_spill] sm:$0xff] %v2390_v47 }
  0xf3   :  { %v2393_v49 = vadd.f32 %v213_v6, %v2238_v55  ;;  %v2396_v50 = vadd.f32 %v286_v39, %v2230_v51  ;;  %v215_v46 = vpop.f32.mrb[14].mxu0  ;;  %v288_v2 = vpop.f32.mrb[14].mxu1 }
  0xf4   :  { %3171 = vst [vmem:[#allocation27_spill] sm:$0xff] %v2382_v43  ;;  %v216_v38 = vadd.f32 %v215_v46, %v2232_v52  ;;  %v2400_v42 = vadd.f32 %v288_v2, %v2224_v48  ;;  %v217_v61 = vpop.f32.mrb[15].mxu0  ;;  %v290_v53 = vpop.f32.mrb[15].mxu1  ;;  %v2405_v54 = vsel %vm346_vm1, %v2241_v58, %v212_v7 }
  0xf5   :  { %3174 = vst [vmem:[#allocation30_spill] sm:$0xff] %v2396_v50  ;;  %v2412_v39 = vadd.f32 %v217_v61, %v2238_v55  ;;  %v2415_v52 = vadd.f32 %v290_v53, %v2230_v51  ;;  %v2434_v51 = vsel %vm346_vm1, %v212_v7, %v2241_v58 }
  0xf6   :  { %3175 = vst [vmem:[#allocation31_spill] sm:$0xff] %v2400_v42  ;;  %v351_v46 = vsel %vm346_vm1, %v182_v5, %v216_v38  ;;  %v353_v55 = vsel %vm2278_vm2, %v2378_v34, %v2400_v42  ;;  %3178 = vst [vmem:[#allocation34_spill] sm:$0xff] %v2434_v51  ;;  %v2458_v61 = vsel %vm346_vm1, %v216_v38, %v182_v5 }
  0xf7   :  { %3176 = vst [vmem:[#allocation32_spill] sm:$0xff] %v2412_v39  ;;  %3177 = vst [vmem:[#allocation33_spill] sm:$0xff] %v2415_v52  ;;  %v352_v53 = vsel %vm2286_vm3, %v2386_v3, %v2412_v39  ;;  %v354_v2 = vsel %vm2290_vm4, %v2390_v47, %v2415_v52 }
  0xf8   :  { %3179 = vst [vmem:[#allocation35_spill] sm:$0xff] %v2458_v61 }
  0xf9   :  { %v549_v7 = vpop.f32.mrb[16].mxu0 }
  0xfa   :  { %v550_v51 = vadd.f32 %v549_v7, %v351_v46  ;;  %v590_v56 = vpop.f32.mrb[16].mxu1  ;;  %v551_v5 = vpop.f32.mrb[17].mxu0  ;;  %v3183_v7 = vld [vmem:[#allocation6_spill] sm:$0xff] }
  0xfb   :  { %v591_v38 = vadd.f32 %v590_v56, %v353_v55  ;;  %v552_v61 = vadd.f32 %v551_v5, %v352_v53  ;;  %v592_v57 = vpop.f32.mrb[17].mxu1  ;;  %v553_v37 = vpop.f32.mrb[18].mxu0  ;;  %v3181_v53 = vld [vmem:[#allocation4_spill] sm:$0xff]  ;;  %v3184_v5 = vld [vmem:[#allocation7_spill] sm:$0xff] }
  0xfc   :  { %v1594_v45 = vmul.f32 -1.442695, %v550_v51  ;;  %v593_v48 = vadd.f32 %v592_v57, %v354_v2  ;;  %v554_v34 = vpop.f32.mrb[19].mxu0  ;;  %v594_v42 = vpop.f32.mrb[18].mxu1 }
  0xfd   :  { %v1595_v40 = vmul.f32 -1.442695, %v552_v61  ;;  %v595_v44 = vpop.f32.mrb[19].mxu1  ;;  %v3180_v61 = vmov 0  }
  0xfe   :  { %1738 = vpow2.f32 %v1594_v45  ;;  %v1596_v6 = vmul.f32 -1.442695, %v593_v48  ;;  %v2478_v44 = vld [vmem:[%s3087_s1] sm:$0xff]  ;;  %v1900_v45 = vmov 7  }
  0xff   :  { %1740 = vpow2.f32 %v1595_v40 }
 0x100   :  { %1742 = vpow2.f32 %v1596_v6 }
 0x101   :  { %1744 = vtanh.f32 %v591_v38  ;;  %v3185_v38 = vld [vmem:[#allocation2_spill] sm:$0xff] }
 0x108   :  { %v1739_v3 = vpop.eup %1738 }
 0x109   :  { %v1741_v39 = vpop.eup %1740  ;;  %v600_v58 = vadd.f32 1.0, %v1739_v3  ;;  %v2482_v3 = vsel %vm346_vm1, 0, %v1900_v45  ;;  %v3188_v45 = vsel %vm2286_vm3, %v2247_v62, %v2393_v49 }
 0x10a   :  { %v606_v46 = vadd.f32 1.0, %v1741_v39  ;;  %v1743_v56 = vpop.eup %1742  ;;  %vm622_vm5 = vcmp.lt.s32.totalorder %v2482_v3, %v2478_v44 }
 0x10b   :  { %1746 = vrcp.f32 %v600_v58  ;;  %v1745_v55 = vpop.eup %1744  ;;  %v613_v34 = vadd.f32 1.0, %v1743_v56  ;;  %vm1597_vm6 = vmpackc.low %vm622_vm5, %vm622_vm5  ;;  %v3182_v58 = vld [vmem:[#allocation5_spill] sm:$0xff] }
 0x10c   :  { %1748 = vrcp.f32 %v606_v46  ;;  %v3186_v46 = vld [vmem:[#allocation3_spill] sm:$0xff] }
 0x10d   :  { %1750 = vrcp.f32 %v613_v34 }
 0x115   :  { %v1747_v37 = vpop.eup %1746 }
 0x116   :  { %v1749_v51 = vpop.eup %1748  ;;  %v617_v57 = vmul.f32 %v1747_v37, %v1745_v55 }
 0x117   :  { %v616_v42 = vmul.f32 0.0, %v1749_v51  ;;  %v1751_v40 = vpop.eup %1750  ;;  %v3187_v51 = vsel %vm2278_vm2, %v2244_v60, %v2382_v43 }
 0x119   :  { %v2472_v2 = vadd.f32 %v617_v57, %v616_v42 }
 0x11b   :  { %1752 = vtanh.f32 %v2472_v2 }
 0x125   :  { %v1753_v6 = vpop.eup %1752 }
 0x126   :  { %v2484_v39 = vmul.f32 %v1753_v6, %v1751_v40  ;;  %v3189_v6 = vsel %vm2290_vm4, %v2250_v63, %v2396_v50 }
 0x128   :  { %v1598_v48 = vpack.c.bf16 %v2484_v39, %v2484_v39 }
 0x12a   :  { %1599 = vmatmul.mubr.msk.bf16.vlgmr.msra.gmra.mrb[20].mxu0 %vm1597_vm6, %v1598_v48  ;;  %1602 = vmatmul.mubr.msk.bf16.vlgmr.msra.gmra.mrb[20].mxu1 %vm1597_vm6, %v1598_v48 }
 0x12b   :  { %746 = vmatpush1.bf16.msra.mxu0 %v1979_v8  ;;  %787 = vmatpush1.bf16.msra.mxu1 %v1985_v9 }
 0x12c   :  { %747 = vmatprep.subr.bf16.mxu0 %v1992_v10  ;;  %788 = vmatprep.subr.bf16.mxu1 %v1999_v11 }
 0x12d   :  { %777 = vmatprep.mubr.bf16.mxu0 %v3180_v61  ;;  %818 = vmatprep.mubr.bf16.mxu1 %v3180_v61 }
 0x12f   :  { %748 = vmatpush1.bf16.msra.mxu0 %v2004_v12  ;;  %789 = vmatpush1.bf16.msra.mxu1 %v2009_v13 }
 0x130   :  { %749 = vmatprep.subr.bf16.mxu0 %v2021_v15  ;;  %790 = vmatprep.subr.bf16.mxu1 %v2027_v16 }
 0x133   :  { %750 = vmatpush1.bf16.msra.mxu0 %v2033_v17  ;;  %791 = vmatpush1.bf16.msra.mxu1 %v2038_v18 }
 0x134   :  { %751 = vmatprep.subr.bf16.mxu0 %v2045_v19  ;;  %792 = vmatprep.subr.bf16.mxu1 %v2051_v20 }
 0x137   :  { %752 = vmatpush1.bf16.msra.mxu0 %v2058_v21  ;;  %793 = vmatpush1.bf16.msra.mxu1 %v2064_v22 }
 0x138   :  { %753 = vmatprep.subr.bf16.mxu0 %v2072_v23  ;;  %794 = vmatprep.subr.bf16.mxu1 %v2079_v24 }
 0x13b   :  { %754 = vmatpush1.bf16.msra.mxu0 %v2088_v26  ;;  %795 = vmatpush1.bf16.msra.mxu1 %v2095_v27 }
 0x13c   :  { %755 = vmatprep.subr.bf16.mxu0 %v2100_v28  ;;  %796 = vmatprep.subr.bf16.mxu1 %v2106_v29 }
 0x13f   :  { %756 = vmatpush1.bf16.msra.mxu0 %v2114_v30  ;;  %797 = vmatpush1.bf16.msra.mxu1 %v2119_v31 }
 0x140   :  { %757 = vmatprep.subr.bf16.mxu0 %v2127_v32  ;;  %798 = vmatprep.subr.bf16.mxu1 %v2134_v33 }
 0x143   :  { %758 = vmatpush1.bf16.msra.mxu0 %v2143_v35  ;;  %799 = vmatpush1.bf16.msra.mxu1 %v2150_v36 }
 0x144   :  { %759 = vmatprep.subr.bf16.mxu0 %v3181_v53  ;;  %800 = vmatprep.subr.bf16.mxu1 %v3182_v58 }
 0x147   :  { %760 = vmatpush1.bf16.msra.mxu0 %v3183_v7  ;;  %801 = vmatpush1.bf16.msra.mxu1 %v3184_v5 }
 0x148   :  { %860 = vmatprep.subr.bf16.mxu0 %v3185_v38  ;;  %901 = vmatprep.subr.bf16.mxu1 %v3186_v46 }
 0x1fd   :  { %v664_v56 = vpop.f32.mrb[20].mxu0  ;;  %v705_v55 = vpop.f32.mrb[20].mxu1 }
 0x1fe   :  { %v665_v37 = vadd.f32 %v664_v56, %v2405_v54  ;;  %v706_v57 = vadd.f32 %v705_v55, %v3187_v51  ;;  %v666_v34 = vpop.f32.mrb[21].mxu0  ;;  %v707_v42 = vpop.f32.mrb[21].mxu1 }
 0x1ff   :  { %v667_v40 = vadd.f32 %v666_v34, %v3188_v45  ;;  %v708_v54 = vadd.f32 %v707_v42, %v3189_v6  ;;  %v668_v48 = vpop.f32.mrb[22].mxu0  ;;  %v709_v56 = vpop.f32.mrb[22].mxu1  ;;  %v1901_v6 = vmov 6  }
 0x200   :  { %v1603_v47 = vmul.f32 -1.442695, %v665_v37  ;;  %v669_v52 = vpop.f32.mrb[23].mxu0  ;;  %v710_v60 = vpop.f32.mrb[23].mxu1  ;;  %v623_v56 = vsel %vm622_vm5, %v2484_v39, 0.0 }
 0x201   :  { %v1604_v55 = vmul.f32 -1.442695, %v667_v40  ;;  %v1605_v51 = vmul.f32 -1.442695, %v708_v54  ;;  %v736_v52 = vsel %vm346_vm1, 1, %v1901_v6 }
 0x202   :  { %1754 = vpow2.f32 %v1603_v47  ;;  %v624_v47 = vsel %vm622_vm5, %v2472_v2, 0.0  ;;  %vm737_vm7 = vcmp.lt.s32.totalorder %v736_v52, %v2478_v44 }
 0x203   :  { %1756 = vpow2.f32 %v1604_v55 }
 0x204   :  { %1758 = vpow2.f32 %v1605_v51  ;;  %v3190_v51 = vld [vmem:[#allocation20_spill] sm:$0xff] }
 0x205   :  { %1760 = vtanh.f32 %v706_v57 }
 0x20c   :  { %v1755_v43 = vpop.eup %1754 }
 0x20d   :  { %v1757_v59 = vpop.eup %1756  ;;  %v715_v14 = vadd.f32 1.0, %v1755_v43 }
 0x20e   :  { %v721_v34 = vadd.f32 1.0, %v1757_v59  ;;  %v1759_v45 = vpop.eup %1758 }
 0x20f   :  { %1762 = vrcp.f32 %v715_v14  ;;  %v1761_v63 = vpop.eup %1760  ;;  %v728_v43 = vadd.f32 1.0, %v1759_v45 }
 0x210   :  { %1764 = vrcp.f32 %v721_v34  ;;  %v3191_v34 = vsel %vm2278_vm2, %v2257_v25, %v3190_v51 }
 0x211   :  { %1766 = vrcp.f32 %v728_v43  ;;  %v3197_v43 = vld [vmem:[#allocation23_spill] sm:$0xff] }
 0x219   :  { %v1763_v42 = vpop.eup %1762 }
 0x21a   :  { %v1765_v60 = vpop.eup %1764  ;;  %v732_v37 = vmul.f32 %v1763_v42, %v1761_v63 }
 0x21b   :  { %v731_v40 = vmul.f32 %v1765_v60, %v624_v47  ;;  %v1767_v57 = vpop.eup %1766  ;;  %v3193_v60 = vld [vmem:[#allocation11_spill] sm:$0xff] }
 0x21d   :  { %v733_v59 = vadd.f32 %v732_v37, %v731_v40 }
 0x21f   :  { %1768 = vtanh.f32 %v733_v59  ;;  %v2551_v14 = vsel %vm737_vm7, %v733_v59, %v624_v47  ;;  %v3194_v47 = vld [vmem:[#allocation22_spill] sm:$0xff] }
 0x220   :  { %v3195_v37 = vsel %vm2286_vm3, %v3193_v60, %v3194_v47 }
 0x229   :  { %v1769_v54 = vpop.eup %1768 }
 0x22a   :  { %v735_v48 = vmul.f32 %v1769_v54, %v1767_v57 }
 0x22c   :  { %v2557_v55 = vsel %vm737_vm7, %v735_v48, %v623_v56 }
 0x22d   :  { %v744_v63 = vpack.c.bf16 %v2557_v55, %v2557_v55 }
 0x22f   :  { %778 = vmatmul.mubr.bf16.vlgmr.msra.gmra.mrb[24].mxu0 %v744_v63  ;;  %819 = vmatmul.mubr.bf16.vlgmr.msra.gmra.mrb[24].mxu1 %v744_v63 }
 0x230   :  { %861 = vmatpush1.bf16.msra.mxu0 %v1979_v8  ;;  %902 = vmatpush1.bf16.msra.mxu1 %v1985_v9 }
 0x231   :  { %862 = vmatprep.subr.bf16.mxu0 %v1992_v10  ;;  %903 = vmatprep.subr.bf16.mxu1 %v1999_v11 }
 0x232   :  { %892 = vmatprep.mubr.bf16.mxu0 %v3180_v61  ;;  %933 = vmatprep.mubr.bf16.mxu1 %v3180_v61 }
 0x234   :  { %863 = vmatpush1.bf16.msra.mxu0 %v2004_v12  ;;  %904 = vmatpush1.bf16.msra.mxu1 %v2009_v13 }
 0x235   :  { %864 = vmatprep.subr.bf16.mxu0 %v2021_v15  ;;  %905 = vmatprep.subr.bf16.mxu1 %v2027_v16 }
 0x238   :  { %865 = vmatpush1.bf16.msra.mxu0 %v2033_v17  ;;  %906 = vmatpush1.bf16.msra.mxu1 %v2038_v18 }
 0x239   :  { %866 = vmatprep.subr.bf16.mxu0 %v2045_v19  ;;  %907 = vmatprep.subr.bf16.mxu1 %v2051_v20 }
 0x23c   :  { %867 = vmatpush1.bf16.msra.mxu0 %v2058_v21  ;;  %908 = vmatpush1.bf16.msra.mxu1 %v2064_v22 }
 0x23d   :  { %868 = vmatprep.subr.bf16.mxu0 %v2072_v23  ;;  %909 = vmatprep.subr.bf16.mxu1 %v2079_v24 }
 0x240   :  { %869 = vmatpush1.bf16.msra.mxu0 %v2088_v26  ;;  %910 = vmatpush1.bf16.msra.mxu1 %v2095_v27 }
 0x241   :  { %870 = vmatprep.subr.bf16.mxu0 %v2100_v28  ;;  %911 = vmatprep.subr.bf16.mxu1 %v2106_v29 }
 0x244   :  { %871 = vmatpush1.bf16.msra.mxu0 %v2114_v30  ;;  %912 = vmatpush1.bf16.msra.mxu1 %v2119_v31 }
 0x245   :  { %872 = vmatprep.subr.bf16.mxu0 %v2127_v32  ;;  %913 = vmatprep.subr.bf16.mxu1 %v2134_v33 }
 0x248   :  { %873 = vmatpush1.bf16.msra.mxu0 %v2143_v35  ;;  %914 = vmatpush1.bf16.msra.mxu1 %v2150_v36 }
 0x249   :  { %874 = vmatprep.subr.bf16.mxu0 %v3181_v53  ;;  %915 = vmatprep.subr.bf16.mxu1 %v3182_v58 }
 0x24c   :  { %875 = vmatpush1.bf16.msra.mxu0 %v3183_v7  ;;  %916 = vmatpush1.bf16.msra.mxu1 %v3184_v5 }
 0x24d   :  { %975 = vmatprep.subr.bf16.mxu0 %v3185_v38  ;;  %1016 = vmatprep.subr.bf16.mxu1 %v3186_v46  ;;  %v3196_v46 = vld [vmem:[#allocation12_spill] sm:$0xff] }
 0x24e   :  { %v3198_v40 = vsel %vm2290_vm4, %v3196_v46, %v3197_v43 }
 0x302   :  { %v779_v2 = vpop.f32.mrb[24].mxu0  ;;  %v820_v3 = vpop.f32.mrb[24].mxu1 }
 0x303   :  { %v780_v39 = vadd.f32 %v779_v2, %v2328_v1  ;;  %v821_v45 = vadd.f32 %v820_v3, %v3191_v34  ;;  %v781_v42 = vpop.f32.mrb[25].mxu0  ;;  %v822_v6 = vpop.f32.mrb[25].mxu1 }
 0x304   :  { %v782_v38 = vadd.f32 %v781_v42, %v3195_v37  ;;  %v823_v1 = vadd.f32 %v822_v6, %v3198_v40  ;;  %v783_v59 = vpop.f32.mrb[26].mxu0  ;;  %v824_v57 = vpop.f32.mrb[26].mxu1  ;;  %v1902_v40 = vmov 5  }
 0x305   :  { %v1606_v54 = vmul.f32 -1.442695, %v780_v39  ;;  %v784_v48 = vpop.f32.mrb[27].mxu0  ;;  %v825_v56 = vpop.f32.mrb[27].mxu1  ;;  %v851_v39 = vsel %vm346_vm1, 2, %v1902_v40 }
 0x306   :  { %v1607_v63 = vmul.f32 -1.442695, %v782_v38  ;;  %v1608_v2 = vmul.f32 -1.442695, %v823_v1  ;;  %vm852_vm8 = vcmp.lt.s32.totalorder %v851_v39, %v2478_v44 }
 0x307   :  { %1770 = vpow2.f32 %v1606_v54 }
 0x308   :  { %1772 = vpow2.f32 %v1607_v63 }
 0x309   :  { %1774 = vpow2.f32 %v1608_v2 }
 0x30a   :  { %1776 = vtanh.f32 %v821_v45 }
 0x311   :  { %v1771_v3 = vpop.eup %1770 }
 0x312   :  { %v1773_v34 = vpop.eup %1772  ;;  %v830_v50 = vadd.f32 1.0, %v1771_v3 }
 0x313   :  { %v836_v42 = vadd.f32 1.0, %v1773_v34  ;;  %v1775_v37 = vpop.eup %1774 }
 0x314   :  { %1778 = vrcp.f32 %v830_v50  ;;  %v1777_v62 = vpop.eup %1776  ;;  %v843_v57 = vadd.f32 1.0, %v1775_v37 }
 0x315   :  { %1780 = vrcp.f32 %v836_v42 }
 0x316   :  { %1782 = vrcp.f32 %v843_v57 }
 0x31e   :  { %v1779_v6 = vpop.eup %1778 }
 0x31f   :  { %v1781_v59 = vpop.eup %1780  ;;  %v847_v38 = vmul.f32 %v1779_v6, %v1777_v62 }
 0x320   :  { %v846_v1 = vmul.f32 %v1781_v59, %v2551_v14  ;;  %v1783_v45 = vpop.eup %1782 }
 0x322   :  { %v848_v54 = vadd.f32 %v847_v38, %v846_v1 }
 0x324   :  { %1784 = vtanh.f32 %v848_v54  ;;  %v2616_v50 = vsel %vm852_vm8, %v848_v54, %v2551_v14 }
 0x32e   :  { %v1785_v48 = vpop.eup %1784 }
 0x32f   :  { %v850_v56 = vmul.f32 %v1785_v48, %v1783_v45  ;;  %v1903_v45 = vmov 4  }
 0x330   :  { %v966_v48 = vsel %vm346_vm1, 3, %v1903_v45 }
 0x331   :  { %v2619_v63 = vsel %vm852_vm8, %v850_v56, %v2557_v55  ;;  %vm967_vm9 = vcmp.lt.s32.totalorder %v966_v48, %v2478_v44 }
 0x332   :  { %v859_v62 = vpack.c.bf16 %v2619_v63, %v2619_v63 }
 0x334   :  { %893 = vmatmul.mubr.bf16.vlgmr.msra.gmra.mrb[28].mxu0 %v859_v62  ;;  %934 = vmatmul.mubr.bf16.vlgmr.msra.gmra.mrb[28].mxu1 %v859_v62 }
 0x335   :  { %976 = vmatpush1.bf16.msra.mxu0 %v1979_v8  ;;  %1017 = vmatpush1.bf16.msra.mxu1 %v1985_v9  ;;  %v2658_v8 = vld [vmem:[%s3085_s3 + $0x4] ss:$16 sps:$4 sm:$0xff]   ;;  %v2664_v9 = vld [vmem:[%s3085_s3 + $0xc] ss:$16 sps:$4 sm:$0xff]  }
 0x336   :  { %977 = vmatprep.subr.bf16.mxu0 %v1992_v10  ;;  %1018 = vmatprep.subr.bf16.mxu1 %v1999_v11 }
 0x337   :  { %1007 = vmatprep.mubr.bf16.mxu0 %v3180_v61  ;;  %1048 = vmatprep.mubr.bf16.mxu1 %v3180_v61 }
 0x339   :  { %978 = vmatpush1.bf16.msra.mxu0 %v2004_v12  ;;  %1019 = vmatpush1.bf16.msra.mxu1 %v2009_v13  ;;  %v3199_v12 = vld [vmem:[#allocation21_spill] sm:$0xff] }
 0x33a   :  { %979 = vmatprep.subr.bf16.mxu0 %v2021_v15  ;;  %1020 = vmatprep.subr.bf16.mxu1 %v2027_v16  ;;  %v3200_v15 = vld [vmem:[#allocation13_spill] sm:$0xff]  ;;  %v3201_v16 = vld [vmem:[#allocation16_spill] sm:$0xff] }
 0x33d   :  { %980 = vmatpush1.bf16.msra.mxu0 %v2033_v17  ;;  %1021 = vmatpush1.bf16.msra.mxu1 %v2038_v18  ;;  %v3202_v17 = vsel %vm2278_vm2, %v3200_v15, %v3201_v16 }
 0x33e   :  { %981 = vmatprep.subr.bf16.mxu0 %v2045_v19  ;;  %1022 = vmatprep.subr.bf16.mxu1 %v2051_v20 }
 0x341   :  { %982 = vmatpush1.bf16.msra.mxu0 %v2058_v21  ;;  %1023 = vmatpush1.bf16.msra.mxu1 %v2064_v22  ;;  %v3203_v21 = vld [vmem:[#allocation14_spill] sm:$0xff] }
 0x342   :  { %983 = vmatprep.subr.bf16.mxu0 %v2072_v23  ;;  %1024 = vmatprep.subr.bf16.mxu1 %v2079_v24  ;;  %v3204_v22 = vld [vmem:[#allocation18_spill] sm:$0xff] }
 0x343   :  { %v3205_v23 = vsel %vm2286_vm3, %v3203_v21, %v3204_v22 }
 0x345   :  { %984 = vmatpush1.bf16.msra.mxu0 %v2088_v26  ;;  %1025 = vmatpush1.bf16.msra.mxu1 %v2095_v27  ;;  %v3206_v26 = vld [vmem:[#allocation15_spill] sm:$0xff] }
 0x346   :  { %985 = vmatprep.subr.bf16.mxu0 %v2100_v28  ;;  %1026 = vmatprep.subr.bf16.mxu1 %v2106_v29  ;;  %v3207_v27 = vld [vmem:[#allocation19_spill] sm:$0xff] }
 0x347   :  { %v3208_v28 = vsel %vm2290_vm4, %v3206_v26, %v3207_v27 }
 0x349   :  { %986 = vmatpush1.bf16.msra.mxu0 %v2114_v30  ;;  %1027 = vmatpush1.bf16.msra.mxu1 %v2119_v31 }
 0x34a   :  { %987 = vmatprep.subr.bf16.mxu0 %v2127_v32  ;;  %1028 = vmatprep.subr.bf16.mxu1 %v2134_v33 }
 0x34d   :  { %988 = vmatpush1.bf16.msra.mxu0 %v2143_v35  ;;  %1029 = vmatpush1.bf16.msra.mxu1 %v2150_v36 }
 0x34e   :  { %989 = vmatprep.subr.bf16.mxu0 %v3181_v53  ;;  %1030 = vmatprep.subr.bf16.mxu1 %v3182_v58 }
 0x351   :  { %990 = vmatpush1.bf16.msra.mxu0 %v3183_v7  ;;  %1031 = vmatpush1.bf16.msra.mxu1 %v3184_v5 }
 0x352   :  { %1090 = vmatprep.subr.bf16.mxu0 %v2658_v8  ;;  %1131 = vmatprep.subr.bf16.mxu1 %v2664_v9 }
 0x407   :  { %v894_v10 = vpop.f32.mrb[28].mxu0  ;;  %v935_v11 = vpop.f32.mrb[28].mxu1 }
 0x408   :  { %v895_v13 = vadd.f32 %v894_v10, %v3199_v12  ;;  %v936_v18 = vadd.f32 %v935_v11, %v3202_v17  ;;  %v896_v19 = vpop.f32.mrb[29].mxu0  ;;  %v937_v20 = vpop.f32.mrb[29].mxu1 }
 0x409   :  { %v897_v24 = vadd.f32 %v896_v19, %v3205_v23  ;;  %v938_v14 = vadd.f32 %v937_v20, %v3208_v28  ;;  %v898_v55 = vpop.f32.mrb[30].mxu0  ;;  %v939_v2 = vpop.f32.mrb[30].mxu1  ;;  %v2716_v28 = vld [vmem:[%s3085_s3 + $0x2c] ss:$16 sps:$4 sm:$0xff]  }
 0x40a   :  { %v1609_v3 = vmul.f32 -1.442695, %v895_v13  ;;  %v899_v34 = vpop.f32.mrb[31].mxu0  ;;  %v940_v42 = vpop.f32.mrb[31].mxu1  ;;  %v2730_v55 = vld [vmem:[%s3085_s3 + $0x28] ss:$16 sps:$4 sm:$0xff]  }
 0x40b   :  { %v1610_v37 = vmul.f32 -1.442695, %v897_v24  ;;  %v1611_v6 = vmul.f32 -1.442695, %v938_v14  ;;  %v2698_v24 = vld [vmem:[%s3085_s3] ss:$16 sps:$4 sm:$0xff]  }
 0x40c   :  { %1786 = vpow2.f32 %v1609_v3  ;;  %v2724_v14 = vld [vmem:[%s3085_s3 + $0x20] ss:$16 sps:$4 sm:$0xff]   ;;  %v2736_v2 = vld [vmem:[%s3085_s3 + $0x44] ss:$16 sps:$4 sm:$0xff]   ;;  %v2742_v3 = vld [vmem:[%s3085_s3 + $0x4c] ss:$16 sps:$4 sm:$0xff]  }
 0x40d   :  { %1788 = vpow2.f32 %v1610_v37  ;;  %v2748_v34 = vld [vmem:[%s3085_s3 + $0x40] ss:$16 sps:$4 sm:$0xff]   ;;  %v2754_v42 = vld [vmem:[%s3085_s3 + $0x48] ss:$16 sps:$4 sm:$0xff]   ;;  %v2760_v37 = vld [vmem:[%s3085_s3 + $0x64] ss:$16 sps:$4 sm:$0xff]  }
 0x40e   :  { %1790 = vpow2.f32 %v1611_v6  ;;  %v2766_v6 = vld [vmem:[%s3085_s3 + $0x6c] ss:$16 sps:$4 sm:$0xff]  }
 0x40f   :  { %1792 = vtanh.f32 %v936_v18 }
 0x416   :  { %v1787_v40 = vpop.eup %1786 }
 0x417   :  { %v1789_v39 = vpop.eup %1788  ;;  %v945_v59 = vadd.f32 1.0, %v1787_v40  ;;  %v2772_v40 = vld [vmem:[%s3085_s3 + $0x60] ss:$16 sps:$4 sm:$0xff]  }
 0x418   :  { %v951_v38 = vadd.f32 1.0, %v1789_v39  ;;  %v1791_v57 = vpop.eup %1790  ;;  %v2778_v39 = vld [vmem:[%s3085_s3 + $0x68] ss:$16 sps:$4 sm:$0xff]  }
 0x419   :  { %1794 = vrcp.f32 %v945_v59  ;;  %v1793_v1 = vpop.eup %1792  ;;  %v958_v10 = vadd.f32 1.0, %v1791_v57  ;;  %v2784_v59 = vld [vmem:[%s3085_s3 + $0x84] ss:$16 sps:$4 sm:$0xff]   ;;  %v2796_v57 = vld [vmem:[%s3085_s3 + $0x80] ss:$16 sps:$4 sm:$0xff]  }
 0x41a   :  { %1796 = vrcp.f32 %v951_v38  ;;  %v2790_v38 = vld [vmem:[%s3085_s3 + $0x8c] ss:$16 sps:$4 sm:$0xff]  }
 0x41b   :  { %1798 = vrcp.f32 %v958_v10 }
 0x423   :  { %v1795_v54 = vpop.eup %1794 }
 0x424   :  { %v1797_v56 = vpop.eup %1796  ;;  %v962_v62 = vmul.f32 %v1795_v54, %v1793_v1  ;;  %v2802_v1 = vld [vmem:[%s3085_s3 + $0x88] ss:$16 sps:$4 sm:$0xff]   ;;  %v2808_v54 = vld [vmem:[%s3085_s3 + $0xa4] ss:$16 sps:$4 sm:$0xff]  }
 0x425   :  { %v961_v11 = vmul.f32 %v1797_v56, %v2616_v50  ;;  %v1799_v17 = vpop.eup %1798 }
 0x427   :  { %v963_v12 = vadd.f32 %v962_v62, %v961_v11 }
 0x429   :  { %1800 = vtanh.f32 %v963_v12  ;;  %v2688_v13 = vsel %vm967_vm9, %v963_v12, %v2616_v50  ;;  %v2704_v50 = vld [vmem:[%s3085_s3 + $0x8] ss:$16 sps:$4 sm:$0xff]  }
 0x433   :  { %v1801_v18 = vpop.eup %1800 }
 0x434   :  { %v965_v19 = vmul.f32 %v1801_v18, %v1799_v17 }
 0x436   :  { %v2691_v20 = vsel %vm967_vm9, %v965_v19, %v2619_v63  ;;  %v2710_v63 = vld [vmem:[%s3085_s3 + $0x24] ss:$16 sps:$4 sm:$0xff]   ;;  %v1904_v19 = vmov 3  }
 0x437   :  { %v974_v23 = vpack.c.bf16 %v2691_v20, %v2691_v20 }
 0x439   :  { %1008 = vmatmul.mubr.bf16.vlgmr.msra.gmra.mrb[32].mxu0 %v974_v23  ;;  %1049 = vmatmul.mubr.bf16.vlgmr.msra.gmra.mrb[32].mxu1 %v974_v23  ;;  %v1081_v23 = vsel %vm346_vm1, 4, %v1904_v19 }
 0x43a   :  { %1091 = vmatpush1.bf16.msra.mxu0 %v2698_v24  ;;  %1132 = vmatpush1.bf16.msra.mxu1 %v2704_v50  ;;  %vm1082_vm10 = vcmp.lt.s32.totalorder %v1081_v23, %v2478_v44 }
 0x43b   :  { %1092 = vmatprep.subr.bf16.mxu0 %v2710_v63  ;;  %1133 = vmatprep.subr.bf16.mxu1 %v2716_v28 }
 0x43c   :  { %1122 = vmatprep.mubr.bf16.mxu0 %v3180_v61  ;;  %1163 = vmatprep.mubr.bf16.mxu1 %v3180_v61 }
 0x43e   :  { %1093 = vmatpush1.bf16.msra.mxu0 %v2724_v14  ;;  %1134 = vmatpush1.bf16.msra.mxu1 %v2730_v55 }
 0x43f   :  { %1094 = vmatprep.subr.bf16.mxu0 %v2736_v2  ;;  %1135 = vmatprep.subr.bf16.mxu1 %v2742_v3 }
 0x442   :  { %1095 = vmatpush1.bf16.msra.mxu0 %v2748_v34  ;;  %1136 = vmatpush1.bf16.msra.mxu1 %v2754_v42 }
 0x443   :  { %1096 = vmatprep.subr.bf16.mxu0 %v2760_v37  ;;  %1137 = vmatprep.subr.bf16.mxu1 %v2766_v6 }
 0x446   :  { %1097 = vmatpush1.bf16.msra.mxu0 %v2772_v40  ;;  %1138 = vmatpush1.bf16.msra.mxu1 %v2778_v39 }
 0x447   :  { %1098 = vmatprep.subr.bf16.mxu0 %v2784_v59  ;;  %1139 = vmatprep.subr.bf16.mxu1 %v2790_v38 }
 0x44a   :  { %1099 = vmatpush1.bf16.msra.mxu0 %v2796_v57  ;;  %1140 = vmatpush1.bf16.msra.mxu1 %v2802_v1 }
 0x44b   :  { %1100 = vmatprep.subr.bf16.mxu0 %v2808_v54  ;;  %1141 = vmatprep.subr.bf16.mxu1 %v2106_v29 }
 0x44e   :  { %1101 = vmatpush1.bf16.msra.mxu0 %v2114_v30  ;;  %1142 = vmatpush1.bf16.msra.mxu1 %v2119_v31  ;;  %v3209_v31 = vld [vmem:[#allocation24_spill] sm:$0xff] }
 0x44f   :  { %1102 = vmatprep.subr.bf16.mxu0 %v2127_v32  ;;  %1143 = vmatprep.subr.bf16.mxu1 %v2134_v33  ;;  %v3210_v33 = vsel %vm2278_vm2, %v3201_v16, %v3200_v15 }
 0x452   :  { %1103 = vmatpush1.bf16.msra.mxu0 %v2143_v35  ;;  %1144 = vmatpush1.bf16.msra.mxu1 %v2150_v36 }
 0x453   :  { %1104 = vmatprep.subr.bf16.mxu0 %v3181_v53  ;;  %1145 = vmatprep.subr.bf16.mxu1 %v3182_v58  ;;  %v3211_v58 = vsel %vm2286_vm3, %v3204_v22, %v3203_v21 }
 0x456   :  { %1105 = vmatpush1.bf16.msra.mxu0 %v3183_v7  ;;  %1146 = vmatpush1.bf16.msra.mxu1 %v3184_v5  ;;  %v3212_v5 = vsel %vm2290_vm4, %v3207_v27, %v3206_v26 }
 0x457   :  { %1205 = vmatprep.subr.bf16.mxu0 %v2658_v8  ;;  %1246 = vmatprep.subr.bf16.mxu1 %v2664_v9 }
 0x50c   :  { %v1009_v29 = vpop.f32.mrb[32].mxu0  ;;  %v1050_v30 = vpop.f32.mrb[32].mxu1 }
 0x50d   :  { %v1010_v32 = vadd.f32 %v1009_v29, %v3209_v31  ;;  %v1051_v35 = vadd.f32 %v1050_v30, %v3210_v33  ;;  %v1011_v36 = vpop.f32.mrb[33].mxu0  ;;  %v1052_v53 = vpop.f32.mrb[33].mxu1 }
 0x50e   :  { %v1012_v7 = vadd.f32 %v1011_v36, %v3211_v58  ;;  %v1053_v45 = vadd.f32 %v1052_v53, %v3212_v5  ;;  %v1013_v48 = vpop.f32.mrb[34].mxu0  ;;  %v1054_v56 = vpop.f32.mrb[34].mxu1 }
 0x50f   :  { %v1612_v62 = vmul.f32 -1.442695, %v1010_v32  ;;  %v1014_v10 = vpop.f32.mrb[35].mxu0  ;;  %v1055_v15 = vpop.f32.mrb[35].mxu1  ;;  %v2894_v48 = vld [vmem:[%s3085_s3 + $0xc4] ss:$16 sps:$4 sm:$0xff]  }
 0x510   :  { %v1613_v16 = vmul.f32 -1.442695, %v1012_v7  ;;  %v1614_v11 = vmul.f32 -1.442695, %v1053_v45  ;;  %v2888_v45 = vld [vmem:[%s3085_s3 + $0xa8] ss:$16 sps:$4 sm:$0xff]  }
 0x511   :  { %1802 = vpow2.f32 %v1612_v62  ;;  %v2900_v56 = vld [vmem:[%s3085_s3 + $0xcc] ss:$16 sps:$4 sm:$0xff]   ;;  %v2906_v62 = vld [vmem:[%s3085_s3 + $0xc0] ss:$16 sps:$4 sm:$0xff]   ;;  %v2912_v10 = vld [vmem:[%s3085_s3 + $0xc8] ss:$16 sps:$4 sm:$0xff]  }
 0x512   :  { %1804 = vpow2.f32 %v1613_v16  ;;  %v2918_v15 = vld [vmem:[%s3085_s3 + $0xe4] ss:$16 sps:$4 sm:$0xff]   ;;  %v2924_v16 = vld [vmem:[%s3085_s3 + $0xec] ss:$16 sps:$4 sm:$0xff]  }
 0x513   :  { %1806 = vpow2.f32 %v1614_v11  ;;  %v2930_v11 = vld [vmem:[%s3085_s3 + $0xe0] ss:$16 sps:$4 sm:$0xff]  }
 0x514   :  { %1808 = vtanh.f32 %v1051_v35 }
 0x51b   :  { %v1803_v12 = vpop.eup %1802 }
 0x51c   :  { %v1805_v17 = vpop.eup %1804  ;;  %v1060_v18 = vadd.f32 1.0, %v1803_v12  ;;  %v2936_v12 = vld [vmem:[%s3085_s3 + $0xe8] ss:$16 sps:$4 sm:$0xff]  }
 0x51d   :  { %v1066_v21 = vadd.f32 1.0, %v1805_v17  ;;  %v1807_v22 = vpop.eup %1806 }
 0x51e   :  { %1810 = vrcp.f32 %v1060_v18  ;;  %v1809_v26 = vpop.eup %1808  ;;  %v1073_v31 = vadd.f32 1.0, %v1807_v22 }
 0x51f   :  { %1812 = vrcp.f32 %v1066_v21  ;;  %v3213_v21 = vld [vmem:[#allocation25_spill] sm:$0xff] }
 0x520   :  { %1814 = vrcp.f32 %v1073_v31 }
 0x528   :  { %v1811_v27 = vpop.eup %1810 }
 0x529   :  { %v1813_v29 = vpop.eup %1812  ;;  %v1077_v30 = vmul.f32 %v1811_v27, %v1809_v26  ;;  %v3214_v26 = vsel %vm2278_vm2, %v3190_v51, %v2257_v25 }
 0x52a   :  { %v1076_v32 = vmul.f32 %v1813_v29, %v2688_v13  ;;  %v1815_v36 = vpop.eup %1814  ;;  %v3215_v29 = vsel %vm2286_vm3, %v3194_v47, %v3193_v60 }
 0x52c   :  { %v1078_v33 = vadd.f32 %v1077_v30, %v1076_v32 }
 0x52e   :  { %1816 = vtanh.f32 %v1078_v33  ;;  %v2845_v35 = vsel %vm1082_vm10, %v1078_v33, %v2688_v13  ;;  %v2876_v13 = vld [vmem:[%s3085_s3 + $0xac] ss:$16 sps:$4 sm:$0xff]  }
 0x538   :  { %v1817_v53 = vpop.eup %1816 }
 0x539   :  { %v1080_v58 = vmul.f32 %v1817_v53, %v1815_v36 }
 0x53b   :  { %v2848_v7 = vsel %vm1082_vm10, %v1080_v58, %v2691_v20  ;;  %v2882_v20 = vld [vmem:[%s3085_s3 + $0xa0] ss:$16 sps:$4 sm:$0xff]  }
 0x53c   :  { %v1089_v5 = vpack.c.bf16 %v2848_v7, %v2848_v7 }
 0x53e   :  { %1123 = vmatmul.mubr.bf16.vlgmr.msra.gmra.mrb[36].mxu0 %v1089_v5  ;;  %1164 = vmatmul.mubr.bf16.vlgmr.msra.gmra.mrb[36].mxu1 %v1089_v5 }
 0x53f   :  { %1206 = vmatpush1.bf16.msra.mxu0 %v2698_v24  ;;  %1247 = vmatpush1.bf16.msra.mxu1 %v2704_v50 }
 0x540   :  { %1207 = vmatprep.subr.bf16.mxu0 %v2710_v63  ;;  %1248 = vmatprep.subr.bf16.mxu1 %v2716_v28 }
 0x541   :  { %1237 = vmatprep.mubr.bf16.mxu0 %v3180_v61  ;;  %1278 = vmatprep.mubr.bf16.mxu1 %v3180_v61 }
 0x543   :  { %1208 = vmatpush1.bf16.msra.mxu0 %v2724_v14  ;;  %1249 = vmatpush1.bf16.msra.mxu1 %v2730_v55 }
 0x544   :  { %1209 = vmatprep.subr.bf16.mxu0 %v2736_v2  ;;  %1250 = vmatprep.subr.bf16.mxu1 %v2742_v3 }
 0x547   :  { %1210 = vmatpush1.bf16.msra.mxu0 %v2748_v34  ;;  %1251 = vmatpush1.bf16.msra.mxu1 %v2754_v42 }
 0x548   :  { %1211 = vmatprep.subr.bf16.mxu0 %v2760_v37  ;;  %1252 = vmatprep.subr.bf16.mxu1 %v2766_v6 }
 0x54b   :  { %1212 = vmatpush1.bf16.msra.mxu0 %v2772_v40  ;;  %1253 = vmatpush1.bf16.msra.mxu1 %v2778_v39 }
 0x54c   :  { %1213 = vmatprep.subr.bf16.mxu0 %v2784_v59  ;;  %1254 = vmatprep.subr.bf16.mxu1 %v2790_v38 }
 0x54f   :  { %1214 = vmatpush1.bf16.msra.mxu0 %v2796_v57  ;;  %1255 = vmatpush1.bf16.msra.mxu1 %v2802_v1 }
 0x550   :  { %1215 = vmatprep.subr.bf16.mxu0 %v2808_v54  ;;  %1256 = vmatprep.subr.bf16.mxu1 %v2876_v13 }
 0x553   :  { %1216 = vmatpush1.bf16.msra.mxu0 %v2882_v20  ;;  %1257 = vmatpush1.bf16.msra.mxu1 %v2888_v45 }
 0x554   :  { %1217 = vmatprep.subr.bf16.mxu0 %v2894_v48  ;;  %1258 = vmatprep.subr.bf16.mxu1 %v2900_v56 }
 0x557   :  { %1218 = vmatpush1.bf16.msra.mxu0 %v2906_v62  ;;  %1259 = vmatpush1.bf16.msra.mxu1 %v2912_v10 }
 0x558   :  { %1219 = vmatprep.subr.bf16.mxu0 %v2918_v15  ;;  %1260 = vmatprep.subr.bf16.mxu1 %v2924_v16 }
 0x55b   :  { %1220 = vmatpush1.bf16.msra.mxu0 %v2930_v11  ;;  %1261 = vmatpush1.bf16.msra.mxu1 %v2936_v12 }
 0x55c   :  { %1320 = vmatprep.subr.bf16.mxu0 %v2658_v8  ;;  %1361 = vmatprep.subr.bf16.mxu1 %v2664_v9  ;;  %v3216_v9 = vsel %vm2290_vm4, %v3197_v43, %v3196_v46 }
 0x611   :  { %v1124_v17 = vpop.f32.mrb[36].mxu0  ;;  %v1165_v18 = vpop.f32.mrb[36].mxu1 }
 0x612   :  { %v1125_v22 = vadd.f32 %v1124_v17, %v3213_v21  ;;  %v1166_v27 = vadd.f32 %v1165_v18, %v3214_v26  ;;  %v1126_v19 = vpop.f32.mrb[37].mxu0  ;;  %v1167_v23 = vpop.f32.mrb[37].mxu1  ;;  %v1905_v18 = vmov 2  }
 0x613   :  { %v1127_v8 = vadd.f32 %v1126_v19, %v3215_v29  ;;  %v1168_v30 = vadd.f32 %v1167_v23, %v3216_v9  ;;  %v1128_v31 = vpop.f32.mrb[38].mxu0  ;;  %v1169_v32 = vpop.f32.mrb[38].mxu1  ;;  %v1196_v21 = vsel %vm346_vm1, 5, %v1905_v18  ;;  %v1731_v18 = vld [vmem:[%s3088_s5 + $0x8] sm:$0xff]  }
 0x614   :  { %v1615_v33 = vmul.f32 -1.442695, %v1125_v22  ;;  %v1129_v36 = vpop.f32.mrb[39].mxu0  ;;  %v1170_v25 = vpop.f32.mrb[39].mxu1  ;;  %vm1197_vm11 = vcmp.lt.s32.totalorder %v1196_v21, %v2478_v44  ;;  %v1732_v21 = vld [vmem:[%s3088_s5 + $0x10] sm:$0xff]  }
 0x615   :  { %v1616_v51 = vmul.f32 -1.442695, %v1127_v8  ;;  %v1617_v53 = vmul.f32 -1.442695, %v1168_v30 }
 0x616   :  { %1818 = vpow2.f32 %v1615_v33 }
 0x617   :  { %1820 = vpow2.f32 %v1616_v51 }
 0x618   :  { %1822 = vpow2.f32 %v1617_v53 }
 0x619   :  { %1824 = vtanh.f32 %v1166_v27 }
 0x620   :  { %v1819_v58 = vpop.eup %1818 }
 0x621   :  { %v1821_v5 = vpop.eup %1820  ;;  %v1175_v17 = vadd.f32 1.0, %v1819_v58 }
 0x622   :  { %v1181_v60 = vadd.f32 1.0, %v1821_v5  ;;  %v1823_v47 = vpop.eup %1822 }
 0x623   :  { %1826 = vrcp.f32 %v1175_v17  ;;  %v1825_v46 = vpop.eup %1824  ;;  %v1188_v19 = vadd.f32 1.0, %v1823_v47 }
 0x624   :  { %1828 = vrcp.f32 %v1181_v60 }
 0x625   :  { %1830 = vrcp.f32 %v1188_v19  ;;  %v1735_v19 = vld [vmem:[%s3088_s5 + $0x28] sm:$0xff]  }
 0x62d   :  { %v1827_v43 = vpop.eup %1826 }
 0x62e   :  { %v1829_v22 = vpop.eup %1828  ;;  %v1192_v26 = vmul.f32 %v1827_v43, %v1825_v46  ;;  %v1907_v43 = vmov 0.0  }
 0x62f   :  { %v1191_v23 = vmul.f32 %v1829_v22, %v2845_v35  ;;  %v1831_v8 = vpop.eup %1830  ;;  %v1733_v22 = vld [vmem:[%s3088_s5 + $0x18] sm:$0xff]  }
 0x631   :  { %v1193_v29 = vadd.f32 %v1192_v26, %v1191_v23  ;;  %v1734_v26 = vld [vmem:[%s3088_s5 + $0x20] sm:$0xff]   ;;  %v1736_v23 = vld [vmem:[%s3088_s5 + $0x30] sm:$0xff]  }
 0x633   :  { %1832 = vtanh.f32 %v1193_v29  ;;  %v2962_v27 = vsel %vm1197_vm11, %v1193_v29, %v2845_v35  ;;  %v1737_v29 = vld [vmem:[%s3088_s5 + $0x38] sm:$0xff]  }
 0x63d   :  { %v1833_v9 = vpop.eup %1832 }
 0x63e   :  { %v1195_v30 = vmul.f32 %v1833_v9, %v1831_v8  ;;  %v3226_v9 = vld [vmem:[#allocation35_spill] sm:$0xff] }
 0x640   :  { %v2965_v31 = vsel %vm1197_vm11, %v1195_v30, %v2848_v7 }
 0x641   :  { %v1204_v32 = vpack.c.bf16 %v2965_v31, %v2965_v31 }
 0x643   :  { %1238 = vmatmul.mubr.bf16.vlgmr.msra.gmra.mrb[40].mxu0 %v1204_v32  ;;  %1279 = vmatmul.mubr.bf16.vlgmr.msra.gmra.mrb[40].mxu1 %v1204_v32  ;;  %v3228_v32 = vld [vmem:[#allocation26_spill] sm:$0xff] }
 0x644   :  { %1321 = vmatpush1.bf16.msra.mxu0 %v2698_v24  ;;  %1362 = vmatpush1.bf16.msra.mxu1 %v2704_v50 }
 0x645   :  { %1322 = vmatprep.subr.bf16.mxu0 %v2710_v63  ;;  %1363 = vmatprep.subr.bf16.mxu1 %v2716_v28  ;;  %v3217_v63 = vld [vmem:[#allocation34_spill] sm:$0xff] }
 0x646   :  { %1352 = vmatprep.mubr.bf16.mxu0 %v3180_v61  ;;  %1393 = vmatprep.mubr.bf16.mxu1 %v3180_v61 }
 0x648   :  { %1323 = vmatpush1.bf16.msra.mxu0 %v2724_v14  ;;  %1364 = vmatpush1.bf16.msra.mxu1 %v2730_v55  ;;  %v3218_v14 = vld [vmem:[#allocation27_spill] sm:$0xff]  ;;  %v3219_v55 = vld [vmem:[#allocation8_spill] sm:$0xff] }
 0x649   :  { %1324 = vmatprep.subr.bf16.mxu0 %v2736_v2  ;;  %1365 = vmatprep.subr.bf16.mxu1 %v2742_v3  ;;  %v3220_v2 = vsel %vm2278_vm2, %v3218_v14, %v3219_v55  ;;  %v3230_v14 = vld [vmem:[#allocation32_spill] sm:$0xff] }
 0x64a   :  { %v3231_v55 = vld [vmem:[#allocation28_spill] sm:$0xff] }
 0x64c   :  { %1325 = vmatpush1.bf16.msra.mxu0 %v2748_v34  ;;  %1366 = vmatpush1.bf16.msra.mxu1 %v2754_v42 }
 0x64d   :  { %1326 = vmatprep.subr.bf16.mxu0 %v2760_v37  ;;  %1367 = vmatprep.subr.bf16.mxu1 %v2766_v6  ;;  %v3221_v37 = vld [vmem:[#allocation9_spill] sm:$0xff] }
 0x64e   :  { %v3222_v6 = vsel %vm2286_vm3, %v2393_v49, %v3221_v37 }
 0x650   :  { %1327 = vmatpush1.bf16.msra.mxu0 %v2772_v40  ;;  %1368 = vmatpush1.bf16.msra.mxu1 %v2778_v39  ;;  %v3223_v39 = vld [vmem:[#allocation30_spill] sm:$0xff] }
 0x651   :  { %1328 = vmatprep.subr.bf16.mxu0 %v2784_v59  ;;  %1369 = vmatprep.subr.bf16.mxu1 %v2790_v38  ;;  %v3224_v59 = vld [vmem:[#allocation10_spill] sm:$0xff] }
 0x652   :  { %v3225_v38 = vsel %vm2290_vm4, %v3223_v39, %v3224_v59 }
 0x654   :  { %1329 = vmatpush1.bf16.msra.mxu0 %v2796_v57  ;;  %1370 = vmatpush1.bf16.msra.mxu1 %v2802_v1 }
 0x655   :  { %1330 = vmatprep.subr.bf16.mxu0 %v2808_v54  ;;  %1371 = vmatprep.subr.bf16.mxu1 %v2876_v13 }
 0x658   :  { %1331 = vmatpush1.bf16.msra.mxu0 %v2882_v20  ;;  %1372 = vmatpush1.bf16.msra.mxu1 %v2888_v45 }
 0x659   :  { %1332 = vmatprep.subr.bf16.mxu0 %v2894_v48  ;;  %1373 = vmatprep.subr.bf16.mxu1 %v2900_v56 }
 0x65c   :  { %1333 = vmatpush1.bf16.msra.mxu0 %v2906_v62  ;;  %1374 = vmatpush1.bf16.msra.mxu1 %v2912_v10 }
 0x65d   :  { %1334 = vmatprep.subr.bf16.mxu0 %v2918_v15  ;;  %1375 = vmatprep.subr.bf16.mxu1 %v2924_v16 }
 0x660   :  { %1335 = vmatpush1.bf16.msra.mxu0 %v2930_v11  ;;  %1376 = vmatpush1.bf16.msra.mxu1 %v2936_v12  ;;  %v1906_v11 = vmov 1  }
 0x661   :  { %v1311_v12 = vsel %vm346_vm1, 6, %v1906_v11  ;;  %1642 = vmatprep.subr.bf16.mxu0 %v1907_v43  ;;  %v1898_v11 = vld [vmem:[%s3087_s1] sm:$0xff] }
 0x662   :  { %vm1312_vm12 = vcmp.lt.s32.totalorder %v1311_v12, %v2478_v44  ;;  %v1730_v44 = vld [vmem:[%s3088_s5] sm:$0xff]  }
 0x716   :  { %v1239_v24 = vpop.f32.mrb[40].mxu0  ;;  %v1280_v50 = vpop.f32.mrb[40].mxu1 }
 0x717   :  { %v1240_v28 = vadd.f32 %v1239_v24, %v3217_v63  ;;  %v1281_v3 = vadd.f32 %v1280_v50, %v3220_v2  ;;  %v1241_v34 = vpop.f32.mrb[41].mxu0  ;;  %v1282_v42 = vpop.f32.mrb[41].mxu1  ;;  %v3232_v2 = vsel %vm2286_vm3, %v3230_v14, %v3231_v55 }
 0x718   :  { %v1242_v40 = vadd.f32 %v1241_v34, %v3222_v6  ;;  %v1283_v57 = vadd.f32 %v1282_v42, %v3225_v38  ;;  %v1243_v1 = vpop.f32.mrb[42].mxu0  ;;  %v1284_v54 = vpop.f32.mrb[42].mxu1  ;;  %v3233_v34 = vld [vmem:[#allocation33_spill] sm:$0xff] }
 0x719   :  { %v1618_v35 = vmul.f32 -1.442695, %v1240_v28  ;;  %v1244_v7 = vpop.f32.mrb[43].mxu0  ;;  %v1285_v13 = vpop.f32.mrb[43].mxu1  ;;  %v3234_v42 = vld [vmem:[#allocation29_spill] sm:$0xff] }
 0x71a   :  { %v1619_v20 = vmul.f32 -1.442695, %v1242_v40  ;;  %v1620_v45 = vmul.f32 -1.442695, %v1283_v57  ;;  %v3235_v37 = vsel %vm2290_vm4, %v3233_v34, %v3234_v42 }
 0x71b   :  { %1834 = vpow2.f32 %v1618_v35 }
 0x71c   :  { %1836 = vpow2.f32 %v1619_v20 }
 0x71d   :  { %1838 = vpow2.f32 %v1620_v45 }
 0x71e   :  { %1840 = vtanh.f32 %v1281_v3 }
 0x725   :  { %v1835_v48 = vpop.eup %1834 }
 0x726   :  { %v1837_v56 = vpop.eup %1836  ;;  %v1290_v62 = vadd.f32 1.0, %v1835_v48 }
 0x727   :  { %v1296_v49 = vadd.f32 1.0, %v1837_v56  ;;  %v1839_v10 = vpop.eup %1838 }
 0x728   :  { %1842 = vrcp.f32 %v1290_v62  ;;  %v1841_v15 = vpop.eup %1840  ;;  %v1303_v25 = vadd.f32 1.0, %v1839_v10  ;;  %v1426_v10 = vsel %vm346_vm1, 7, %v3180_v61 }
 0x729   :  { %1844 = vrcp.f32 %v1296_v49  ;;  %vm1427_vm14 = vcmp.lt.s32.totalorder %v1426_v10, %v1898_v11 }
 0x72a   :  { %1846 = vrcp.f32 %v1303_v25  ;;  %v1624_v25 = vld [vmem:[%s3089_s6] ss:$0 sm:$0xff] }
 0x732   :  { %v1843_v16 = vpop.eup %1842 }
 0x733   :  { %v1845_v33 = vpop.eup %1844  ;;  %v1307_v36 = vmul.f32 %v1843_v16, %v1841_v15 }
 0x734   :  { %v1306_v51 = vmul.f32 %v1845_v33, %v2962_v27  ;;  %v1847_v5 = vpop.eup %1846 }
 0x736   :  { %v1308_v53 = vadd.f32 %v1307_v36, %v1306_v51 }
 0x738   :  { %1848 = vtanh.f32 %v1308_v53  ;;  %v3022_v58 = vsel %vm1312_vm12, %v1308_v53, %v2962_v27 }
 0x742   :  { %v1849_v17 = vpop.eup %1848 }
 0x743   :  { %v1310_v60 = vmul.f32 %v1849_v17, %v1847_v5 }
 0x745   :  { %v3025_v47 = vsel %vm1312_vm12, %v1310_v60, %v2965_v31  ;;  %v3227_v31 = vld [vmem:[#allocation31_spill] sm:$0xff] }
 0x746   :  { %v1319_v46 = vpack.c.bf16 %v3025_v47, %v3025_v47  ;;  %v3229_v24 = vsel %vm2278_vm2, %v3227_v31, %v3228_v32 }
 0x748   :  { %1353 = vmatmul.mubr.bf16.vlgmr.msra.gmra.mrb[44].mxu0 %v1319_v46  ;;  %1394 = vmatmul.mubr.bf16.vlgmr.msra.gmra.mrb[44].mxu1 %v1319_v46 }
 0x749   :  { %1643 = vmatpush3.bf16.msra.mxu0 %v1730_v44  ;;  %1658 = vmatprep.mubr.msk.bf16.mxu0 %vm1908_vm13, %v1907_v43 }
 0x74a   :  { %1644 = vmatprep.subr.bf16.mxu0 %v1907_v43 }
 0x74d   :  { %1645 = vmatpush3.bf16.msra.mxu0 %v1731_v18 }
 0x74e   :  { %1646 = vmatprep.subr.bf16.mxu0 %v1907_v43 }
 0x751   :  { %1647 = vmatpush3.bf16.msra.mxu0 %v1732_v21 }
 0x752   :  { %1648 = vmatprep.subr.bf16.mxu0 %v1907_v43 }
 0x755   :  { %1649 = vmatpush3.bf16.msra.mxu0 %v1733_v22 }
 0x756   :  { %1650 = vmatprep.subr.bf16.mxu0 %v1907_v43 }
 0x759   :  { %1651 = vmatpush3.bf16.msra.mxu0 %v1734_v26 }
 0x75a   :  { %1652 = vmatprep.subr.bf16.mxu0 %v1907_v43 }
 0x75d   :  { %1653 = vmatpush3.bf16.msra.mxu0 %v1735_v19 }
 0x75e   :  { %1654 = vmatprep.subr.bf16.mxu0 %v1907_v43 }
 0x761   :  { %1655 = vmatpush3.bf16.msra.mxu0 %v1736_v23 }
 0x762   :  { %1656 = vmatprep.subr.bf16.mxu0 %v1907_v43 }
 0x765   :  { %1657 = vmatpush3.bf16.msra.mxu0 %v1737_v29 }
 0x81b   :  { %v1354_v27 = vpop.f32.mrb[44].mxu0  ;;  %v1395_v8 = vpop.f32.mrb[44].mxu1 }
 0x81c   :  { %v1355_v30 = vadd.f32 %v1354_v27, %v3226_v9  ;;  %v1396_v50 = vadd.f32 %v1395_v8, %v3229_v24  ;;  %v1356_v63 = vpop.f32.mrb[45].mxu0  ;;  %v1397_v28 = vpop.f32.mrb[45].mxu1 }
 0x81d   :  { %v1357_v3 = vadd.f32 %v1356_v63, %v3232_v2  ;;  %v1398_v6 = vadd.f32 %v1397_v28, %v3235_v37  ;;  %v1358_v40 = vpop.f32.mrb[46].mxu0  ;;  %v1399_v41 = vpop.f32.mrb[46].mxu1 }
 0x81e   :  { %v1621_v39 = vmul.f32 -1.442695, %v1355_v30  ;;  %v1359_v59 = vpop.f32.mrb[47].mxu0  ;;  %v1400_v38 = vpop.f32.mrb[47].mxu1 }
 0x81f   :  { %v1622_v57 = vmul.f32 -1.442695, %v1357_v3  ;;  %v1623_v1 = vmul.f32 -1.442695, %v1398_v6 }
 0x820   :  { %1850 = vpow2.f32 %v1621_v39 }
 0x821   :  { %1852 = vpow2.f32 %v1622_v57 }
 0x822   :  { %1854 = vpow2.f32 %v1623_v1 }
 0x823   :  { %1856 = vtanh.f32 %v1396_v50 }
 0x82a   :  { %v1851_v52 = vpop.eup %1850 }
 0x82b   :  { %v1853_v54 = vpop.eup %1852  ;;  %v1405_v35 = vadd.f32 1.0, %v1851_v52 }
 0x82c   :  { %v1411_v7 = vadd.f32 1.0, %v1853_v54  ;;  %v1855_v4 = vpop.eup %1854 }
 0x82d   :  { %1858 = vrcp.f32 %v1405_v35  ;;  %v1857_v13 = vpop.eup %1856  ;;  %v1418_v56 = vadd.f32 1.0, %v1855_v4 }
 0x82e   :  { %1860 = vrcp.f32 %v1411_v7 }
 0x82f   :  { %1862 = vrcp.f32 %v1418_v56 }
 0x837   :  { %v1859_v20 = vpop.eup %1858 }
 0x838   :  { %v1861_v45 = vpop.eup %1860  ;;  %v1422_v48 = vmul.f32 %v1859_v20, %v1857_v13 }
 0x839   :  { %v1421_v62 = vmul.f32 %v1861_v45, %v3022_v58  ;;  %v1863_v15 = vpop.eup %1862 }
 0x83b   :  { %v1423_v49 = vadd.f32 %v1422_v48, %v1421_v62 }
 0x83d   :  { %1864 = vtanh.f32 %v1423_v49 }
 0x847   :  { %v1865_v16 = vpop.eup %1864 }
 0x848   :  { %v1425_v12 = vmul.f32 %v1865_v16, %v1863_v15 }
 0x84a   :  { %v1428_v33 = vsel %vm1427_vm14, %v1425_v12, %v3025_v47 }
 0x84b   :  { %v1429_v36 = vpack.c.bf16 %v1428_v33, %v1428_v33 }
 0x84d   :  { %1659 = vmatmul.mubr.bf16.vlgmr.msra.gmra.mrb[48].mxu0 %v1429_v36 }
 0x920   :  { %v1535_v51 = vpop.f32.mrb[48].mxu0 }
 0x921   :  { %v1536_v53 = vadd.f32 %v1624_v25, %v1535_v51  ;;  %v1660_v0 = vpop.f32.mrb[49].mxu0 }
 0x922   :  { %v1538_v61 = vpop.f32.mrb[50].mxu0 }
 0x923   :  { %1541 = vst [vmem:[%s3090_s7] sm:$0xff] %v1536_v53  ;;  %v1661_v58 = vpop.f32.mrb[51].mxu0 }

</bundles_post_ra>
